<compile_context>
chip_gen: v7x
topology: tpu7x:2x2x1
jax: 0.10.0
libtpu: 0.0.40
codegen_flags: <defaults>
</compile_context>

<pallas_src>
import jax
import jax.numpy as jnp
from jax.experimental import pallas as pl
from jax.experimental.pallas import tpu as pltpu

D_MODEL = 32
NHEAD = 4
HEAD_DIM = D_MODEL // NHEAD
DIM_FF = 64
EPS = 1e-5
NEG = -1e30
VEC_ROWS = 16      # 13 rows used, padded to a sublane multiple
VEC_W = 128        # lane-aligned LN/bias slab width (>= 3*D_MODEL, >= DIM_FF)


# --------------------------------------------------------------------------
# in-kernel helpers (traced inside the Pallas kernel body)
# --------------------------------------------------------------------------
def _layernorm(x, gamma, beta):
    mu = jnp.mean(x, axis=-1, keepdims=True)
    var = jnp.mean((x - mu) ** 2, axis=-1, keepdims=True)
    return (x - mu) * jax.lax.rsqrt(var + EPS) * gamma + beta


def _mha(q, k, v, mask, wo_ref, bo, mm_dtype):
    """Multi-head attention on 2-D (rows, d_model) operands.

    q is pre-scaled by 1/sqrt(head_dim) (folded into Wq/bq in the wrapper).
    `mask` is an optional (rows_q, rows_k) boolean keep-mask (None == keep all).
    The per-head outputs are lane-concatenated so the output projection is a
    single K=d_model matmul instead of NHEAD K=head_dim matmuls + adds.
    """
    qm = q.astype(mm_dtype)
    km = k.astype(mm_dtype)
    vm = v.astype(mm_dtype)
    heads = []
    # NHEAD is tiny & static -> fully unrolled; for large row blocks wrap this
    # in lax.fori_loop(..., unroll=True) to bound per-head live ranges.
    for h in range(NHEAD):
        lo = h * HEAD_DIM
        # contract head_dim of both operands directly (no explicit k.T / XLU)
        s = jax.lax.dot_general(
            qm[:, lo:lo + HEAD_DIM], km[:, lo:lo + HEAD_DIM],
            (((1,), (1,)), ((), ())), preferred_element_type=jnp.float32)
        if mask is not None:
            s = jnp.where(mask, s, NEG)
        m = jnp.max(s, axis=-1, keepdims=True)
        p = jnp.exp(s - m)
        p = p * pl.reciprocal(jnp.sum(p, axis=-1, keepdims=True), approx=True)
        heads.append(jnp.dot(p.astype(mm_dtype), vm[:, lo:lo + HEAD_DIM],
                             preferred_element_type=jnp.float32))
    o = jnp.concatenate(heads, axis=-1)                   # (rows_q, d_model)
    return jnp.dot(o.astype(mm_dtype), wo_ref[...],
                   preferred_element_type=jnp.float32) + bo


# --------------------------------------------------------------------------
# fused decoder-layer kernel: one grid step == one batch row-block
# --------------------------------------------------------------------------
def _make_kernel(nb, s_tgt, s_enc, mm_dtype):
    D, F = D_MODEL, DIM_FF

    def kernel(tgt_ref, enc_ref, vec_ref, w_qkv_ref, w_sa_o_ref, w_ca_q_ref,
               w_ca_kv_ref, w_ca_o_ref, w1_ref, w2_ref, o_ref):
        x_in = tgt_ref[...].astype(jnp.float32)           # (R, D), R = nb*s_tgt
        enc = enc_ref[...].astype(jnp.float32)            # (Rk, D), Rk = nb*s_enc
        vec = vec_ref[...]                                 # (16, 128) LN/bias slab
        R = x_in.shape[0]
        Rk = enc.shape[0]

        # ---- attention keep-masks generated in-kernel (cheap VPU iota/compare;
        #      no O(R^2) HBM bias slab, no unaligned bias slicing) -------------
        ri = jax.lax.broadcasted_iota(jnp.int32, (R, R), 0)
        ci = jax.lax.broadcasted_iota(jnp.int32, (R, R), 1)
        if nb > 1:
            self_mask = (((ri // s_tgt) == (ci // s_tgt))
                         & ((ci % s_tgt) <= (ri % s_tgt)))
            rj = jax.lax.broadcasted_iota(jnp.int32, (R, Rk), 0)
            cj = jax.lax.broadcasted_iota(jnp.int32, (R, Rk), 1)
            cross_mask = (rj // s_tgt) == (cj // s_enc)
        else:
            self_mask = ci <= ri                           # plain causal
            cross_mask = None                              # attend to all enc rows

        # ---- self-attention (pre-LN), fused QKV projection -------------------
        x = _layernorm(x_in, vec[0:1, :D], vec[1:2, :D])
        qkv = jnp.dot(x.astype(mm_dtype), w_qkv_ref[...],
                      preferred_element_type=jnp.float32) + vec[6:7, :3 * D]
        x = x + _mha(qkv[:, 0:D], qkv[:, D:2 * D], qkv[:, 2 * D:3 * D],
                     self_mask, w_sa_o_ref, vec[7:8, :D], mm_dtype)

        # ---- cross-attention (pre-LN), fused KV projection --------------------
        x = _layernorm(x, vec[2:3, :D], vec[3:4, :D])
        qc = jnp.dot(x.astype(mm_dtype), w_ca_q_ref[...],
                     preferred_element_type=jnp.float32) + vec[8:9, :D]
        kv = jnp.dot(enc.astype(mm_dtype), w_ca_kv_ref[...],
                     preferred_element_type=jnp.float32) + vec[9:10, :2 * D]
        x = x + _mha(qc, kv[:, 0:D], kv[:, D:2 * D],
                     cross_mask, w_ca_o_ref, vec[10:11, :D], mm_dtype)

        # ---- pre-LN feed-forward with internal residual ------------------------
        y = _layernorm(x, vec[4:5, :D], vec[5:6, :D])
        h = jnp.maximum(
            jnp.dot(y.astype(mm_dtype), w1_ref[...],
                    preferred_element_type=jnp.float32) + vec[11:12, :F], 0.0)
        x = x + (jnp.dot(h.astype(mm_dtype), w2_ref[...],
                         preferred_element_type=jnp.float32) + vec[12:13, :D])

        o_ref[...] = x.astype(o_ref.dtype)

    return kernel


# --------------------------------------------------------------------------
# wrapper
# --------------------------------------------------------------------------
def _pick_batches_per_step(batch, seq, target_rows=256):
    """Largest batches/step whose row block stays <= target_rows while still
    leaving >= 2 grid steps (DMA/compute overlap + v7x 2-TensorCore sharding).
    At scale, also bounds the quadratic (R, R) score/mask VMEM growth."""
    best = 1
    for nb in range(1, batch + 1):
        if batch % nb:
            continue
        if nb * seq <= target_rows and (batch // nb >= 2 or batch == 1):
            best = nb
    return best


def _const_spec(shape):
    """Grid-invariant operand: constant index_map. Single-buffered (the block
    never changes, so one VMEM buffer suffices) when jax supports it."""
    idx = lambda i: tuple(0 for _ in shape)
    try:
        return pl.BlockSpec(shape, idx, pipeline_mode=pl.Buffered(1))
    except Exception:  # older jax without pipeline_mode on BlockSpec
        return pl.BlockSpec(shape, idx)


def decoder_layer(tgt, enc, params, *, batch_per_step=None,
                  matmul_dtype=jnp.bfloat16):
    """Fused pre-LN TransformerDecoderLayer forward.

    matmul_dtype: MXU operand dtype (weights + activation casts at dot sites).
    Accumulation / LayerNorm / softmax / residual stream stay f32.
    """
    B, S, D = tgt.shape
    assert D == D_MODEL
    S_enc = enc.shape[1]
    NB = (_pick_batches_per_step(B, S) if batch_per_step is None
          else batch_per_step)
    assert B % NB == 0
    R, Rk = NB * S, NB * S_enc
    assert R % 8 == 0 and Rk % 8 == 0, "row blocks must be sublane-aligned"

    scale = 1.0 / float(HEAD_DIM) ** 0.5

    def mm(w):
        return jnp.asarray(w, jnp.float32).astype(matmul_dtype)

    # separate, internally fused weight operands: every in-kernel ref read is a
    # full, aligned view (no lane-offset slab slices / masked loads)
    w_qkv = mm(jnp.concatenate([params["sa_wq"] * scale, params["sa_wk"],
                                params["sa_wv"]], axis=1))            # (D, 3D)
    w_sa_o = mm(params["sa_wo"])                                       # (D, D)
    w_ca_q = mm(params["ca_wq"] * scale)                               # (D, D)
    w_ca_kv = mm(jnp.concatenate([params["ca_wk"], params["ca_wv"]],
                                 axis=1))                              # (D, 2D)
    w_ca_o = mm(params["ca_wo"])                                       # (D, D)
    w1 = mm(params["w1"])                                              # (D, F)
    w2 = mm(params["w2"])                                              # (F, D)

    # LN params + biases: one small f32 slab, every row starts at lane 0
    def row(*vs):
        v = jnp.concatenate(
            [jnp.asarray(x, jnp.float32).reshape(1, -1) for x in vs], axis=1)
        return jnp.pad(v, ((0, 0), (0, VEC_W - v.shape[1])))

    vec = jnp.concatenate([
        row(params["n1_g"]), row(params["n1_b"]),
        row(params["n2_g"]), row(params["n2_b"]),
        row(params["ff_g"]), row(params["ff_b"]),
        row(params["sa_bq"] * scale, params["sa_bk"], params["sa_bv"]),
        row(params["sa_bo"]),
        row(params["ca_bq"] * scale),
        row(params["ca_bk"], params["ca_bv"]),
        row(params["ca_bo"]),
        row(params["b1"]),
        row(params["b2"]),
        jnp.zeros((VEC_ROWS - 13, VEC_W), jnp.float32),
    ], axis=0)

    tgt2 = tgt.reshape(B * S, D).astype(jnp.float32)
    enc2 = enc.reshape(B * S_enc, D).astype(jnp.float32)

    kernel = _make_kernel(NB, S, S_enc, matmul_dtype)

    out2 = pl.pallas_call(
        kernel,
        out_shape=jax.ShapeDtypeStruct((B * S, D), jnp.float32),
        grid_spec=pltpu.PrefetchScalarGridSpec(
            num_scalar_prefetch=0,
            grid=(B // NB,),
            in_specs=[
                pl.BlockSpec((R, D), lambda i: (i, 0)),     # tgt row block
                pl.BlockSpec((Rk, D), lambda i: (i, 0)),    # encoder row block
                _const_spec(vec.shape),
                _const_spec(w_qkv.shape), _const_spec(w_sa_o.shape),
                _const_spec(w_ca_q.shape), _const_spec(w_ca_kv.shape),
                _const_spec(w_ca_o.shape), _const_spec(w1.shape),
                _const_spec(w2.shape),
            ],
            out_specs=pl.BlockSpec((R, D), lambda i: (i, 0)),
        ),
        # NOTE: at larger d_model/seq also set vmem_limit_bytes here and size
        # NB so the per-step (R, R)/(R, Rk) score intermediates fit v7x's VMEM.
        compiler_params=pltpu.CompilerParams(
            dimension_semantics=("parallel",)),
    )(tgt2, enc2, vec, w_qkv, w_sa_o, w_ca_q, w_ca_kv, w_ca_o, w1, w2)
    return out2.reshape(B, S, D)


# --------------------------------------------------------------------------
# pure-JAX reference (for correctness check)
# --------------------------------------------------------------------------
def _ref_ln(x, g, b):
    mu = x.mean(-1, keepdims=True)
    var = ((x - mu) ** 2).mean(-1, keepdims=True)
    return (x - mu) / jnp.sqrt(var + EPS) * g + b


def _ref_mha(q_in, kv_in, wq, bq, wk, bk, wv, bv, wo, bo, causal):
    B, Sq, _ = q_in.shape
    Sk = kv_in.shape[1]
    q = (q_in @ wq + bq).reshape(B, Sq, NHEAD, HEAD_DIM).transpose(0, 2, 1, 3)
    k = (kv_in @ wk + bk).reshape(B, Sk, NHEAD, HEAD_DIM).transpose(0, 2, 1, 3)
    v = (kv_in @ wv + bv).reshape(B, Sk, NHEAD, HEAD_DIM).transpose(0, 2, 1, 3)
    s = jnp.einsum("bhqd,bhkd->bhqk", q, k) / (HEAD_DIM ** 0.5)
    if causal:
        mask = jnp.tril(jnp.ones((Sq, Sk), bool))
        s = jnp.where(mask, s, -1e30)
    p = jax.nn.softmax(s, axis=-1)
    o = jnp.einsum("bhqk,bhkd->bhqd", p, v).transpose(0, 2, 1, 3).reshape(B, Sq, D_MODEL)
    return o @ wo + bo


def ref_decoder_layer(tgt, enc, p):
    x = _ref_ln(tgt, p["n1_g"], p["n1_b"])
    x = x + _ref_mha(x, x, p["sa_wq"], p["sa_bq"], p["sa_wk"], p["sa_bk"],
                     p["sa_wv"], p["sa_bv"], p["sa_wo"], p["sa_bo"], True)
    x = _ref_ln(x, p["n2_g"], p["n2_b"])
    x = x + _ref_mha(x, enc, p["ca_wq"], p["ca_bq"], p["ca_wk"], p["ca_bk"],
                     p["ca_wv"], p["ca_bv"], p["ca_wo"], p["ca_bo"], False)
    y = _ref_ln(x, p["ff_g"], p["ff_b"])
    h = jnp.maximum(y @ p["w1"] + p["b1"], 0.0)
    return x + h @ p["w2"] + p["b2"]


# --------------------------------------------------------------------------
def make_params(key):
    ks = iter(jax.random.split(key, 32))

    def w(shape):
        return jax.random.normal(next(ks), shape, jnp.float32) * 0.05

    p = {}
    for name in ("n1", "n2", "ff"):
        p[f"{name}_g"] = 1.0 + w((1, D_MODEL))
        p[f"{name}_b"] = w((1, D_MODEL))
    for pre in ("sa", "ca"):
        for nm in ("q", "k", "v", "o"):
            p[f"{pre}_w{nm}"] = w((D_MODEL, D_MODEL))
            p[f"{pre}_b{nm}"] = w((1, D_MODEL))
    p["w1"] = w((D_MODEL, DIM_FF))
    p["b1"] = w((1, DIM_FF))
    p["w2"] = w((DIM_FF, D_MODEL))
    p["b2"] = w((1, D_MODEL))
    return p


if __name__ == "__main__":
    key = jax.random.PRNGKey(0)
    k_tgt, k_enc, k_par = jax.random.split(key, 3)

    B, S, S_ENC = 2, 8, 16
    tgt = jax.random.normal(k_tgt, (B, S, D_MODEL), jnp.float32)
    enc = jax.random.normal(k_enc, (B, S_ENC, D_MODEL), jnp.float32)
    params = make_params(k_par)

    ref = ref_decoder_layer(tgt, enc, params)

    # f32 MXU operands, per-batch grid steps (default NB): tight tolerance
    out_f32 = jax.block_until_ready(
        decoder_layer(tgt, enc, params, matmul_dtype=jnp.float32))
    assert out_f32.shape == (B, S, D_MODEL)
    assert jnp.allclose(out_f32, ref, rtol=5e-3, atol=5e-3), \
        "f32 kernel mismatch vs JAX reference"

    # f32, whole batch folded into one grid step: exercises the in-kernel
    # block-diagonal batch masks (nb > 1 path)
    out_fold = jax.block_until_ready(
        decoder_layer(tgt, enc, params, batch_per_step=B,
                      matmul_dtype=jnp.float32))
    assert jnp.allclose(out_fold, ref, rtol=5e-3, atol=5e-3), \
        "folded-batch kernel mismatch vs JAX reference"

    # bf16 MXU operands (default: 2x MXU throughput, half the weight DMA)
    out_bf16 = jax.block_until_ready(decoder_layer(tgt, enc, params))
    assert jnp.allclose(out_bf16, ref, rtol=3e-2, atol=3e-2), \
        "bf16 kernel mismatch vs JAX reference"

    print("KERNEL_OK")
</pallas_src>

<mosaic_0001>
module attributes {stable_mosaic.version = 11 : i64} {
  func.func @kernel(%arg0: i32, %arg1: memref<8x32xf32, #tpu.memory_space<vmem>>, %arg2: memref<16x32xf32, #tpu.memory_space<vmem>>, %arg3: memref<16x128xf32, #tpu.memory_space<vmem>>, %arg4: memref<32x96xf32, #tpu.memory_space<vmem>>, %arg5: memref<32x32xf32, #tpu.memory_space<vmem>>, %arg6: memref<32x32xf32, #tpu.memory_space<vmem>>, %arg7: memref<32x64xf32, #tpu.memory_space<vmem>>, %arg8: memref<32x32xf32, #tpu.memory_space<vmem>>, %arg9: memref<32x64xf32, #tpu.memory_space<vmem>>, %arg10: memref<64x32xf32, #tpu.memory_space<vmem>>, %arg11: memref<8x32xf32, #tpu.memory_space<vmem>>) attributes {dimension_semantics = [#tpu.dimension_semantics<parallel>], iteration_bounds = array<i64: 2>, scalar_prefetch = 0 : i64, scratch_operands = 0 : i64, tpu.core_type = #tpu.core_type<tc>, window_params = [{transform_indices = @transform_0, window_bounds = array<i64: 8, 32>}, {transform_indices = @transform_1, window_bounds = array<i64: 16, 32>}, {pipeline_mode = #tpu.pipeline_mode<synchronous>, transform_indices = @transform_2, window_bounds = array<i64: 16, 128>}, {pipeline_mode = #tpu.pipeline_mode<synchronous>, transform_indices = @transform_3, window_bounds = array<i64: 32, 96>}, {pipeline_mode = #tpu.pipeline_mode<synchronous>, transform_indices = @transform_4, window_bounds = array<i64: 32, 32>}, {pipeline_mode = #tpu.pipeline_mode<synchronous>, transform_indices = @transform_5, window_bounds = array<i64: 32, 32>}, {pipeline_mode = #tpu.pipeline_mode<synchronous>, transform_indices = @transform_6, window_bounds = array<i64: 32, 64>}, {pipeline_mode = #tpu.pipeline_mode<synchronous>, transform_indices = @transform_7, window_bounds = array<i64: 32, 32>}, {pipeline_mode = #tpu.pipeline_mode<synchronous>, transform_indices = @transform_8, window_bounds = array<i64: 32, 64>}, {pipeline_mode = #tpu.pipeline_mode<synchronous>, transform_indices = @transform_9, window_bounds = array<i64: 64, 32>}, {transform_indices = @transform_10, window_bounds = array<i64: 8, 32>}]} {
    %c0 = arith.constant 0 : index
    %c0_0 = arith.constant 0 : index
    %0 = vector.load %arg1[%c0, %c0_0] : memref<8x32xf32, #tpu.memory_space<vmem>>, vector<8x32xf32>
    %c0_1 = arith.constant 0 : index
    %c0_2 = arith.constant 0 : index
    %1 = vector.load %arg2[%c0_1, %c0_2] : memref<16x32xf32, #tpu.memory_space<vmem>>, vector<16x32xf32>
    %c0_3 = arith.constant 0 : index
    %c0_4 = arith.constant 0 : index
    %2 = vector.load %arg3[%c0_3, %c0_4] : memref<16x128xf32, #tpu.memory_space<vmem>>, vector<16x128xf32>
    %3 = tpu.iota {dimensions = array<i32: 0>} : vector<8x8xi32>
    %4 = tpu.iota {dimensions = array<i32: 1>} : vector<8x8xi32>
    %5 = arith.cmpi sle, %4, %3 : vector<8x8xi32>
    %6 = vector.extract_strided_slice %2 {offsets = [0, 0], sizes = [1, 32], strides = [1, 1]} : vector<16x128xf32> to vector<1x32xf32>
    %7 = vector.extract_strided_slice %2 {offsets = [1, 0], sizes = [1, 32], strides = [1, 1]} : vector<16x128xf32> to vector<1x32xf32>
    %cst = arith.constant dense<0.000000e+00> : vector<8xf32>
    %8 = vector.multi_reduction <add>, %0, %cst [1] : vector<8x32xf32> to vector<8xf32>
    %9 = vector.shape_cast %8 : vector<8xf32> to vector<8x1xf32>
    %cst_5 = arith.constant 3.200000e+01 : f32
    %10 = vector.broadcast %cst_5 : f32 to vector<8x1xf32>
    %11 = arith.divf %9, %10 : vector<8x1xf32>
    %12 = vector.broadcast %11 : vector<8x1xf32> to vector<8x32xf32>
    %13 = arith.subf %0, %12 : vector<8x32xf32>
    %14 = arith.mulf %13, %13 : vector<8x32xf32>
    %cst_6 = arith.constant dense<0.000000e+00> : vector<8xf32>
    %15 = vector.multi_reduction <add>, %14, %cst_6 [1] : vector<8x32xf32> to vector<8xf32>
    %16 = vector.shape_cast %15 : vector<8xf32> to vector<8x1xf32>
    %cst_7 = arith.constant 3.200000e+01 : f32
    %17 = vector.broadcast %cst_7 : f32 to vector<8x1xf32>
    %18 = arith.divf %16, %17 : vector<8x1xf32>
    %19 = vector.broadcast %11 : vector<8x1xf32> to vector<8x32xf32>
    %20 = arith.subf %0, %19 : vector<8x32xf32>
    %cst_8 = arith.constant 9.99999974E-6 : f32
    %21 = vector.broadcast %cst_8 : f32 to vector<8x1xf32>
    %22 = arith.addf %18, %21 : vector<8x1xf32>
    %23 = math.rsqrt %22 : vector<8x1xf32>
    %24 = vector.broadcast %23 : vector<8x1xf32> to vector<8x32xf32>
    %25 = arith.mulf %20, %24 : vector<8x32xf32>
    %26 = vector.broadcast %6 : vector<1x32xf32> to vector<8x32xf32>
    %27 = arith.mulf %25, %26 : vector<8x32xf32>
    %28 = vector.broadcast %7 : vector<1x32xf32> to vector<8x32xf32>
    %29 = arith.addf %27, %28 : vector<8x32xf32>
    %c0_9 = arith.constant 0 : index
    %c0_10 = arith.constant 0 : index
    %30 = vector.load %arg4[%c0_9, %c0_10] : memref<32x96xf32, #tpu.memory_space<vmem>>, vector<32x96xf32>
    %cst_11 = arith.constant dense<0.000000e+00> : vector<8x96xf32>
    %31 = tpu.matmul %29, %30, %cst_11 {dimension_numbers = #tpu.dot_dimension_numbers<[1], [0], [0], [1], [0, 0, 1, 1], [], []>} : vector<8x32xf32>, vector<32x96xf32>, vector<8x96xf32> -> vector<8x96xf32>
    %32 = vector.extract_strided_slice %2 {offsets = [6, 0], sizes = [1, 96], strides = [1, 1]} : vector<16x128xf32> to vector<1x96xf32>
    %33 = vector.broadcast %32 : vector<1x96xf32> to vector<8x96xf32>
    %34 = arith.addf %31, %33 : vector<8x96xf32>
    %35 = vector.extract_strided_slice %34 {offsets = [0, 0], sizes = [8, 32], strides = [1, 1]} : vector<8x96xf32> to vector<8x32xf32>
    %36 = vector.extract_strided_slice %34 {offsets = [0, 32], sizes = [8, 32], strides = [1, 1]} : vector<8x96xf32> to vector<8x32xf32>
    %37 = vector.extract_strided_slice %34 {offsets = [0, 64], sizes = [8, 32], strides = [1, 1]} : vector<8x96xf32> to vector<8x32xf32>
    %38 = vector.extract_strided_slice %2 {offsets = [7, 0], sizes = [1, 32], strides = [1, 1]} : vector<16x128xf32> to vector<1x32xf32>
    %39 = vector.extract_strided_slice %35 {offsets = [0, 0], sizes = [8, 8], strides = [1, 1]} : vector<8x32xf32> to vector<8x8xf32>
    %40 = vector.extract_strided_slice %36 {offsets = [0, 0], sizes = [8, 8], strides = [1, 1]} : vector<8x32xf32> to vector<8x8xf32>
    %cst_12 = arith.constant dense<0.000000e+00> : vector<8x8xf32>
    %41 = tpu.matmul %39, %40, %cst_12 {dimension_numbers = #tpu.dot_dimension_numbers<[1], [1], [0], [0], [0, 0, 1, 0], [], []>} : vector<8x8xf32>, vector<8x8xf32>, vector<8x8xf32> -> vector<8x8xf32>
    %cst_13 = arith.constant -1.000000e+30 : f32
    %42 = vector.broadcast %cst_13 : f32 to vector<8x8xf32>
    %43 = arith.select %5, %41, %42 : vector<8x8xi1>, vector<8x8xf32>
    %cst_14 = arith.constant dense<0xFF800000> : vector<8xf32>
    %44 = vector.multi_reduction <maximumf>, %43, %cst_14 [1] : vector<8x8xf32> to vector<8xf32>
    %45 = vector.shape_cast %44 : vector<8xf32> to vector<8x1xf32>
    %46 = vector.broadcast %45 : vector<8x1xf32> to vector<8x8xf32>
    %47 = arith.subf %43, %46 : vector<8x8xf32>
    %48 = math.exp %47 : vector<8x8xf32>
    %cst_15 = arith.constant dense<0.000000e+00> : vector<8xf32>
    %49 = vector.multi_reduction <add>, %48, %cst_15 [1] : vector<8x8xf32> to vector<8xf32>
    %50 = vector.shape_cast %49 : vector<8xf32> to vector<8x1xf32>
    %51 = tpu.reciprocal %50 {approx = true} : vector<8x1xf32> -> vector<8x1xf32>
    %52 = vector.broadcast %51 : vector<8x1xf32> to vector<8x8xf32>
    %53 = arith.mulf %48, %52 : vector<8x8xf32>
    %54 = vector.extract_strided_slice %37 {offsets = [0, 0], sizes = [8, 8], strides = [1, 1]} : vector<8x32xf32> to vector<8x8xf32>
    %cst_16 = arith.constant dense<0.000000e+00> : vector<8x8xf32>
    %55 = tpu.matmul %53, %54, %cst_16 {dimension_numbers = #tpu.dot_dimension_numbers<[1], [0], [0], [1], [0, 0, 1, 1], [], []>} : vector<8x8xf32>, vector<8x8xf32>, vector<8x8xf32> -> vector<8x8xf32>
    %56 = vector.extract_strided_slice %35 {offsets = [0, 8], sizes = [8, 8], strides = [1, 1]} : vector<8x32xf32> to vector<8x8xf32>
    %57 = vector.extract_strided_slice %36 {offsets = [0, 8], sizes = [8, 8], strides = [1, 1]} : vector<8x32xf32> to vector<8x8xf32>
    %cst_17 = arith.constant dense<0.000000e+00> : vector<8x8xf32>
    %58 = tpu.matmul %56, %57, %cst_17 {dimension_numbers = #tpu.dot_dimension_numbers<[1], [1], [0], [0], [0, 0, 1, 0], [], []>} : vector<8x8xf32>, vector<8x8xf32>, vector<8x8xf32> -> vector<8x8xf32>
    %cst_18 = arith.constant -1.000000e+30 : f32
    %59 = vector.broadcast %cst_18 : f32 to vector<8x8xf32>
    %60 = arith.select %5, %58, %59 : vector<8x8xi1>, vector<8x8xf32>
    %cst_19 = arith.constant dense<0xFF800000> : vector<8xf32>
    %61 = vector.multi_reduction <maximumf>, %60, %cst_19 [1] : vector<8x8xf32> to vector<8xf32>
    %62 = vector.shape_cast %61 : vector<8xf32> to vector<8x1xf32>
    %63 = vector.broadcast %62 : vector<8x1xf32> to vector<8x8xf32>
    %64 = arith.subf %60, %63 : vector<8x8xf32>
    %65 = math.exp %64 : vector<8x8xf32>
    %cst_20 = arith.constant dense<0.000000e+00> : vector<8xf32>
    %66 = vector.multi_reduction <add>, %65, %cst_20 [1] : vector<8x8xf32> to vector<8xf32>
    %67 = vector.shape_cast %66 : vector<8xf32> to vector<8x1xf32>
    %68 = tpu.reciprocal %67 {approx = true} : vector<8x1xf32> -> vector<8x1xf32>
    %69 = vector.broadcast %68 : vector<8x1xf32> to vector<8x8xf32>
    %70 = arith.mulf %65, %69 : vector<8x8xf32>
    %71 = vector.extract_strided_slice %37 {offsets = [0, 8], sizes = [8, 8], strides = [1, 1]} : vector<8x32xf32> to vector<8x8xf32>
    %cst_21 = arith.constant dense<0.000000e+00> : vector<8x8xf32>
    %72 = tpu.matmul %70, %71, %cst_21 {dimension_numbers = #tpu.dot_dimension_numbers<[1], [0], [0], [1], [0, 0, 1, 1], [], []>} : vector<8x8xf32>, vector<8x8xf32>, vector<8x8xf32> -> vector<8x8xf32>
    %73 = vector.extract_strided_slice %35 {offsets = [0, 16], sizes = [8, 8], strides = [1, 1]} : vector<8x32xf32> to vector<8x8xf32>
    %74 = vector.extract_strided_slice %36 {offsets = [0, 16], sizes = [8, 8], strides = [1, 1]} : vector<8x32xf32> to vector<8x8xf32>
    %cst_22 = arith.constant dense<0.000000e+00> : vector<8x8xf32>
    %75 = tpu.matmul %73, %74, %cst_22 {dimension_numbers = #tpu.dot_dimension_numbers<[1], [1], [0], [0], [0, 0, 1, 0], [], []>} : vector<8x8xf32>, vector<8x8xf32>, vector<8x8xf32> -> vector<8x8xf32>
    %cst_23 = arith.constant -1.000000e+30 : f32
    %76 = vector.broadcast %cst_23 : f32 to vector<8x8xf32>
    %77 = arith.select %5, %75, %76 : vector<8x8xi1>, vector<8x8xf32>
    %cst_24 = arith.constant dense<0xFF800000> : vector<8xf32>
    %78 = vector.multi_reduction <maximumf>, %77, %cst_24 [1] : vector<8x8xf32> to vector<8xf32>
    %79 = vector.shape_cast %78 : vector<8xf32> to vector<8x1xf32>
    %80 = vector.broadcast %79 : vector<8x1xf32> to vector<8x8xf32>
    %81 = arith.subf %77, %80 : vector<8x8xf32>
    %82 = math.exp %81 : vector<8x8xf32>
    %cst_25 = arith.constant dense<0.000000e+00> : vector<8xf32>
    %83 = vector.multi_reduction <add>, %82, %cst_25 [1] : vector<8x8xf32> to vector<8xf32>
    %84 = vector.shape_cast %83 : vector<8xf32> to vector<8x1xf32>
    %85 = tpu.reciprocal %84 {approx = true} : vector<8x1xf32> -> vector<8x1xf32>
    %86 = vector.broadcast %85 : vector<8x1xf32> to vector<8x8xf32>
    %87 = arith.mulf %82, %86 : vector<8x8xf32>
    %88 = vector.extract_strided_slice %37 {offsets = [0, 16], sizes = [8, 8], strides = [1, 1]} : vector<8x32xf32> to vector<8x8xf32>
    %cst_26 = arith.constant dense<0.000000e+00> : vector<8x8xf32>
    %89 = tpu.matmul %87, %88, %cst_26 {dimension_numbers = #tpu.dot_dimension_numbers<[1], [0], [0], [1], [0, 0, 1, 1], [], []>} : vector<8x8xf32>, vector<8x8xf32>, vector<8x8xf32> -> vector<8x8xf32>
    %90 = vector.extract_strided_slice %35 {offsets = [0, 24], sizes = [8, 8], strides = [1, 1]} : vector<8x32xf32> to vector<8x8xf32>
    %91 = vector.extract_strided_slice %36 {offsets = [0, 24], sizes = [8, 8], strides = [1, 1]} : vector<8x32xf32> to vector<8x8xf32>
    %cst_27 = arith.constant dense<0.000000e+00> : vector<8x8xf32>
    %92 = tpu.matmul %90, %91, %cst_27 {dimension_numbers = #tpu.dot_dimension_numbers<[1], [1], [0], [0], [0, 0, 1, 0], [], []>} : vector<8x8xf32>, vector<8x8xf32>, vector<8x8xf32> -> vector<8x8xf32>
    %cst_28 = arith.constant -1.000000e+30 : f32
    %93 = vector.broadcast %cst_28 : f32 to vector<8x8xf32>
    %94 = arith.select %5, %92, %93 : vector<8x8xi1>, vector<8x8xf32>
    %cst_29 = arith.constant dense<0xFF800000> : vector<8xf32>
    %95 = vector.multi_reduction <maximumf>, %94, %cst_29 [1] : vector<8x8xf32> to vector<8xf32>
    %96 = vector.shape_cast %95 : vector<8xf32> to vector<8x1xf32>
    %97 = vector.broadcast %96 : vector<8x1xf32> to vector<8x8xf32>
    %98 = arith.subf %94, %97 : vector<8x8xf32>
    %99 = math.exp %98 : vector<8x8xf32>
    %cst_30 = arith.constant dense<0.000000e+00> : vector<8xf32>
    %100 = vector.multi_reduction <add>, %99, %cst_30 [1] : vector<8x8xf32> to vector<8xf32>
    %101 = vector.shape_cast %100 : vector<8xf32> to vector<8x1xf32>
    %102 = tpu.reciprocal %101 {approx = true} : vector<8x1xf32> -> vector<8x1xf32>
    %103 = vector.broadcast %102 : vector<8x1xf32> to vector<8x8xf32>
    %104 = arith.mulf %99, %103 : vector<8x8xf32>
    %105 = vector.extract_strided_slice %37 {offsets = [0, 24], sizes = [8, 8], strides = [1, 1]} : vector<8x32xf32> to vector<8x8xf32>
    %cst_31 = arith.constant dense<0.000000e+00> : vector<8x8xf32>
    %106 = tpu.matmul %104, %105, %cst_31 {dimension_numbers = #tpu.dot_dimension_numbers<[1], [0], [0], [1], [0, 0, 1, 1], [], []>} : vector<8x8xf32>, vector<8x8xf32>, vector<8x8xf32> -> vector<8x8xf32>
    %107 = tpu.concatenate %55, %72, %89, %106 in 1 : vector<8x8xf32>, vector<8x8xf32>, vector<8x8xf32>, vector<8x8xf32> -> vector<8x32xf32>
    %c0_32 = arith.constant 0 : index
    %c0_33 = arith.constant 0 : index
    %108 = vector.load %arg5[%c0_32, %c0_33] : memref<32x32xf32, #tpu.memory_space<vmem>>, vector<32x32xf32>
    %cst_34 = arith.constant dense<0.000000e+00> : vector<8x32xf32>
    %109 = tpu.matmul %107, %108, %cst_34 {dimension_numbers = #tpu.dot_dimension_numbers<[1], [0], [0], [1], [0, 0, 1, 1], [], []>} : vector<8x32xf32>, vector<32x32xf32>, vector<8x32xf32> -> vector<8x32xf32>
    %110 = vector.broadcast %38 : vector<1x32xf32> to vector<8x32xf32>
    %111 = arith.addf %109, %110 : vector<8x32xf32>
    %112 = arith.addf %29, %111 : vector<8x32xf32>
    %113 = vector.extract_strided_slice %2 {offsets = [2, 0], sizes = [1, 32], strides = [1, 1]} : vector<16x128xf32> to vector<1x32xf32>
    %114 = vector.extract_strided_slice %2 {offsets = [3, 0], sizes = [1, 32], strides = [1, 1]} : vector<16x128xf32> to vector<1x32xf32>
    %cst_35 = arith.constant dense<0.000000e+00> : vector<8xf32>
    %115 = vector.multi_reduction <add>, %112, %cst_35 [1] : vector<8x32xf32> to vector<8xf32>
    %116 = vector.shape_cast %115 : vector<8xf32> to vector<8x1xf32>
    %cst_36 = arith.constant 3.200000e+01 : f32
    %117 = vector.broadcast %cst_36 : f32 to vector<8x1xf32>
    %118 = arith.divf %116, %117 : vector<8x1xf32>
    %119 = vector.broadcast %118 : vector<8x1xf32> to vector<8x32xf32>
    %120 = arith.subf %112, %119 : vector<8x32xf32>
    %121 = arith.mulf %120, %120 : vector<8x32xf32>
    %cst_37 = arith.constant dense<0.000000e+00> : vector<8xf32>
    %122 = vector.multi_reduction <add>, %121, %cst_37 [1] : vector<8x32xf32> to vector<8xf32>
    %123 = vector.shape_cast %122 : vector<8xf32> to vector<8x1xf32>
    %cst_38 = arith.constant 3.200000e+01 : f32
    %124 = vector.broadcast %cst_38 : f32 to vector<8x1xf32>
    %125 = arith.divf %123, %124 : vector<8x1xf32>
    %126 = vector.broadcast %118 : vector<8x1xf32> to vector<8x32xf32>
    %127 = arith.subf %112, %126 : vector<8x32xf32>
    %cst_39 = arith.constant 9.99999974E-6 : f32
    %128 = vector.broadcast %cst_39 : f32 to vector<8x1xf32>
    %129 = arith.addf %125, %128 : vector<8x1xf32>
    %130 = math.rsqrt %129 : vector<8x1xf32>
    %131 = vector.broadcast %130 : vector<8x1xf32> to vector<8x32xf32>
    %132 = arith.mulf %127, %131 : vector<8x32xf32>
    %133 = vector.broadcast %113 : vector<1x32xf32> to vector<8x32xf32>
    %134 = arith.mulf %132, %133 : vector<8x32xf32>
    %135 = vector.broadcast %114 : vector<1x32xf32> to vector<8x32xf32>
    %136 = arith.addf %134, %135 : vector<8x32xf32>
    %c0_40 = arith.constant 0 : index
    %c0_41 = arith.constant 0 : index
    %137 = vector.load %arg6[%c0_40, %c0_41] : memref<32x32xf32, #tpu.memory_space<vmem>>, vector<32x32xf32>
    %cst_42 = arith.constant dense<0.000000e+00> : vector<8x32xf32>
    %138 = tpu.matmul %136, %137, %cst_42 {dimension_numbers = #tpu.dot_dimension_numbers<[1], [0], [0], [1], [0, 0, 1, 1], [], []>} : vector<8x32xf32>, vector<32x32xf32>, vector<8x32xf32> -> vector<8x32xf32>
    %139 = vector.extract_strided_slice %2 {offsets = [8, 0], sizes = [1, 32], strides = [1, 1]} : vector<16x128xf32> to vector<1x32xf32>
    %140 = vector.broadcast %139 : vector<1x32xf32> to vector<8x32xf32>
    %141 = arith.addf %138, %140 : vector<8x32xf32>
    %c0_43 = arith.constant 0 : index
    %c0_44 = arith.constant 0 : index
    %142 = vector.load %arg7[%c0_43, %c0_44] : memref<32x64xf32, #tpu.memory_space<vmem>>, vector<32x64xf32>
    %cst_45 = arith.constant dense<0.000000e+00> : vector<16x64xf32>
    %143 = tpu.matmul %1, %142, %cst_45 {dimension_numbers = #tpu.dot_dimension_numbers<[1], [0], [0], [1], [0, 0, 1, 1], [], []>} : vector<16x32xf32>, vector<32x64xf32>, vector<16x64xf32> -> vector<16x64xf32>
    %144 = vector.extract_strided_slice %2 {offsets = [9, 0], sizes = [1, 64], strides = [1, 1]} : vector<16x128xf32> to vector<1x64xf32>
    %145 = vector.broadcast %144 : vector<1x64xf32> to vector<16x64xf32>
    %146 = arith.addf %143, %145 : vector<16x64xf32>
    %147 = vector.extract_strided_slice %146 {offsets = [0, 0], sizes = [16, 32], strides = [1, 1]} : vector<16x64xf32> to vector<16x32xf32>
    %148 = vector.extract_strided_slice %146 {offsets = [0, 32], sizes = [16, 32], strides = [1, 1]} : vector<16x64xf32> to vector<16x32xf32>
    %149 = vector.extract_strided_slice %2 {offsets = [10, 0], sizes = [1, 32], strides = [1, 1]} : vector<16x128xf32> to vector<1x32xf32>
    %150 = vector.extract_strided_slice %141 {offsets = [0, 0], sizes = [8, 8], strides = [1, 1]} : vector<8x32xf32> to vector<8x8xf32>
    %151 = vector.extract_strided_slice %147 {offsets = [0, 0], sizes = [16, 8], strides = [1, 1]} : vector<16x32xf32> to vector<16x8xf32>
    %cst_46 = arith.constant dense<0.000000e+00> : vector<8x16xf32>
    %152 = tpu.matmul %150, %151, %cst_46 {dimension_numbers = #tpu.dot_dimension_numbers<[1], [1], [0], [0], [0, 0, 1, 0], [], []>} : vector<8x8xf32>, vector<16x8xf32>, vector<8x16xf32> -> vector<8x16xf32>
    %cst_47 = arith.constant dense<0xFF800000> : vector<8xf32>
    %153 = vector.multi_reduction <maximumf>, %152, %cst_47 [1] : vector<8x16xf32> to vector<8xf32>
    %154 = vector.shape_cast %153 : vector<8xf32> to vector<8x1xf32>
    %155 = vector.broadcast %154 : vector<8x1xf32> to vector<8x16xf32>
    %156 = arith.subf %152, %155 : vector<8x16xf32>
    %157 = math.exp %156 : vector<8x16xf32>
    %cst_48 = arith.constant dense<0.000000e+00> : vector<8xf32>
    %158 = vector.multi_reduction <add>, %157, %cst_48 [1] : vector<8x16xf32> to vector<8xf32>
    %159 = vector.shape_cast %158 : vector<8xf32> to vector<8x1xf32>
    %160 = tpu.reciprocal %159 {approx = true} : vector<8x1xf32> -> vector<8x1xf32>
    %161 = vector.broadcast %160 : vector<8x1xf32> to vector<8x16xf32>
    %162 = arith.mulf %157, %161 : vector<8x16xf32>
    %163 = vector.extract_strided_slice %148 {offsets = [0, 0], sizes = [16, 8], strides = [1, 1]} : vector<16x32xf32> to vector<16x8xf32>
    %cst_49 = arith.constant dense<0.000000e+00> : vector<8x8xf32>
    %164 = tpu.matmul %162, %163, %cst_49 {dimension_numbers = #tpu.dot_dimension_numbers<[1], [0], [0], [1], [0, 0, 1, 1], [], []>} : vector<8x16xf32>, vector<16x8xf32>, vector<8x8xf32> -> vector<8x8xf32>
    %165 = vector.extract_strided_slice %141 {offsets = [0, 8], sizes = [8, 8], strides = [1, 1]} : vector<8x32xf32> to vector<8x8xf32>
    %166 = vector.extract_strided_slice %147 {offsets = [0, 8], sizes = [16, 8], strides = [1, 1]} : vector<16x32xf32> to vector<16x8xf32>
    %cst_50 = arith.constant dense<0.000000e+00> : vector<8x16xf32>
    %167 = tpu.matmul %165, %166, %cst_50 {dimension_numbers = #tpu.dot_dimension_numbers<[1], [1], [0], [0], [0, 0, 1, 0], [], []>} : vector<8x8xf32>, vector<16x8xf32>, vector<8x16xf32> -> vector<8x16xf32>
    %cst_51 = arith.constant dense<0xFF800000> : vector<8xf32>
    %168 = vector.multi_reduction <maximumf>, %167, %cst_51 [1] : vector<8x16xf32> to vector<8xf32>
    %169 = vector.shape_cast %168 : vector<8xf32> to vector<8x1xf32>
    %170 = vector.broadcast %169 : vector<8x1xf32> to vector<8x16xf32>
    %171 = arith.subf %167, %170 : vector<8x16xf32>
    %172 = math.exp %171 : vector<8x16xf32>
    %cst_52 = arith.constant dense<0.000000e+00> : vector<8xf32>
    %173 = vector.multi_reduction <add>, %172, %cst_52 [1] : vector<8x16xf32> to vector<8xf32>
    %174 = vector.shape_cast %173 : vector<8xf32> to vector<8x1xf32>
    %175 = tpu.reciprocal %174 {approx = true} : vector<8x1xf32> -> vector<8x1xf32>
    %176 = vector.broadcast %175 : vector<8x1xf32> to vector<8x16xf32>
    %177 = arith.mulf %172, %176 : vector<8x16xf32>
    %178 = vector.extract_strided_slice %148 {offsets = [0, 8], sizes = [16, 8], strides = [1, 1]} : vector<16x32xf32> to vector<16x8xf32>
    %cst_53 = arith.constant dense<0.000000e+00> : vector<8x8xf32>
    %179 = tpu.matmul %177, %178, %cst_53 {dimension_numbers = #tpu.dot_dimension_numbers<[1], [0], [0], [1], [0, 0, 1, 1], [], []>} : vector<8x16xf32>, vector<16x8xf32>, vector<8x8xf32> -> vector<8x8xf32>
    %180 = vector.extract_strided_slice %141 {offsets = [0, 16], sizes = [8, 8], strides = [1, 1]} : vector<8x32xf32> to vector<8x8xf32>
    %181 = vector.extract_strided_slice %147 {offsets = [0, 16], sizes = [16, 8], strides = [1, 1]} : vector<16x32xf32> to vector<16x8xf32>
    %cst_54 = arith.constant dense<0.000000e+00> : vector<8x16xf32>
    %182 = tpu.matmul %180, %181, %cst_54 {dimension_numbers = #tpu.dot_dimension_numbers<[1], [1], [0], [0], [0, 0, 1, 0], [], []>} : vector<8x8xf32>, vector<16x8xf32>, vector<8x16xf32> -> vector<8x16xf32>
    %cst_55 = arith.constant dense<0xFF800000> : vector<8xf32>
    %183 = vector.multi_reduction <maximumf>, %182, %cst_55 [1] : vector<8x16xf32> to vector<8xf32>
    %184 = vector.shape_cast %183 : vector<8xf32> to vector<8x1xf32>
    %185 = vector.broadcast %184 : vector<8x1xf32> to vector<8x16xf32>
    %186 = arith.subf %182, %185 : vector<8x16xf32>
    %187 = math.exp %186 : vector<8x16xf32>
    %cst_56 = arith.constant dense<0.000000e+00> : vector<8xf32>
    %188 = vector.multi_reduction <add>, %187, %cst_56 [1] : vector<8x16xf32> to vector<8xf32>
    %189 = vector.shape_cast %188 : vector<8xf32> to vector<8x1xf32>
    %190 = tpu.reciprocal %189 {approx = true} : vector<8x1xf32> -> vector<8x1xf32>
    %191 = vector.broadcast %190 : vector<8x1xf32> to vector<8x16xf32>
    %192 = arith.mulf %187, %191 : vector<8x16xf32>
    %193 = vector.extract_strided_slice %148 {offsets = [0, 16], sizes = [16, 8], strides = [1, 1]} : vector<16x32xf32> to vector<16x8xf32>
    %cst_57 = arith.constant dense<0.000000e+00> : vector<8x8xf32>
    %194 = tpu.matmul %192, %193, %cst_57 {dimension_numbers = #tpu.dot_dimension_numbers<[1], [0], [0], [1], [0, 0, 1, 1], [], []>} : vector<8x16xf32>, vector<16x8xf32>, vector<8x8xf32> -> vector<8x8xf32>
    %195 = vector.extract_strided_slice %141 {offsets = [0, 24], sizes = [8, 8], strides = [1, 1]} : vector<8x32xf32> to vector<8x8xf32>
    %196 = vector.extract_strided_slice %147 {offsets = [0, 24], sizes = [16, 8], strides = [1, 1]} : vector<16x32xf32> to vector<16x8xf32>
    %cst_58 = arith.constant dense<0.000000e+00> : vector<8x16xf32>
    %197 = tpu.matmul %195, %196, %cst_58 {dimension_numbers = #tpu.dot_dimension_numbers<[1], [1], [0], [0], [0, 0, 1, 0], [], []>} : vector<8x8xf32>, vector<16x8xf32>, vector<8x16xf32> -> vector<8x16xf32>
    %cst_59 = arith.constant dense<0xFF800000> : vector<8xf32>
    %198 = vector.multi_reduction <maximumf>, %197, %cst_59 [1] : vector<8x16xf32> to vector<8xf32>
    %199 = vector.shape_cast %198 : vector<8xf32> to vector<8x1xf32>
    %200 = vector.broadcast %199 : vector<8x1xf32> to vector<8x16xf32>
    %201 = arith.subf %197, %200 : vector<8x16xf32>
    %202 = math.exp %201 : vector<8x16xf32>
    %cst_60 = arith.constant dense<0.000000e+00> : vector<8xf32>
    %203 = vector.multi_reduction <add>, %202, %cst_60 [1] : vector<8x16xf32> to vector<8xf32>
    %204 = vector.shape_cast %203 : vector<8xf32> to vector<8x1xf32>
    %205 = tpu.reciprocal %204 {approx = true} : vector<8x1xf32> -> vector<8x1xf32>
    %206 = vector.broadcast %205 : vector<8x1xf32> to vector<8x16xf32>
    %207 = arith.mulf %202, %206 : vector<8x16xf32>
    %208 = vector.extract_strided_slice %148 {offsets = [0, 24], sizes = [16, 8], strides = [1, 1]} : vector<16x32xf32> to vector<16x8xf32>
    %cst_61 = arith.constant dense<0.000000e+00> : vector<8x8xf32>
    %209 = tpu.matmul %207, %208, %cst_61 {dimension_numbers = #tpu.dot_dimension_numbers<[1], [0], [0], [1], [0, 0, 1, 1], [], []>} : vector<8x16xf32>, vector<16x8xf32>, vector<8x8xf32> -> vector<8x8xf32>
    %210 = tpu.concatenate %164, %179, %194, %209 in 1 : vector<8x8xf32>, vector<8x8xf32>, vector<8x8xf32>, vector<8x8xf32> -> vector<8x32xf32>
    %c0_62 = arith.constant 0 : index
    %c0_63 = arith.constant 0 : index
    %211 = vector.load %arg8[%c0_62, %c0_63] : memref<32x32xf32, #tpu.memory_space<vmem>>, vector<32x32xf32>
    %cst_64 = arith.constant dense<0.000000e+00> : vector<8x32xf32>
    %212 = tpu.matmul %210, %211, %cst_64 {dimension_numbers = #tpu.dot_dimension_numbers<[1], [0], [0], [1], [0, 0, 1, 1], [], []>} : vector<8x32xf32>, vector<32x32xf32>, vector<8x32xf32> -> vector<8x32xf32>
    %213 = vector.broadcast %149 : vector<1x32xf32> to vector<8x32xf32>
    %214 = arith.addf %212, %213 : vector<8x32xf32>
    %215 = arith.addf %136, %214 : vector<8x32xf32>
    %216 = vector.extract_strided_slice %2 {offsets = [4, 0], sizes = [1, 32], strides = [1, 1]} : vector<16x128xf32> to vector<1x32xf32>
    %217 = vector.extract_strided_slice %2 {offsets = [5, 0], sizes = [1, 32], strides = [1, 1]} : vector<16x128xf32> to vector<1x32xf32>
    %cst_65 = arith.constant dense<0.000000e+00> : vector<8xf32>
    %218 = vector.multi_reduction <add>, %215, %cst_65 [1] : vector<8x32xf32> to vector<8xf32>
    %219 = vector.shape_cast %218 : vector<8xf32> to vector<8x1xf32>
    %cst_66 = arith.constant 3.200000e+01 : f32
    %220 = vector.broadcast %cst_66 : f32 to vector<8x1xf32>
    %221 = arith.divf %219, %220 : vector<8x1xf32>
    %222 = vector.broadcast %221 : vector<8x1xf32> to vector<8x32xf32>
    %223 = arith.subf %215, %222 : vector<8x32xf32>
    %224 = arith.mulf %223, %223 : vector<8x32xf32>
    %cst_67 = arith.constant dense<0.000000e+00> : vector<8xf32>
    %225 = vector.multi_reduction <add>, %224, %cst_67 [1] : vector<8x32xf32> to vector<8xf32>
    %226 = vector.shape_cast %225 : vector<8xf32> to vector<8x1xf32>
    %cst_68 = arith.constant 3.200000e+01 : f32
    %227 = vector.broadcast %cst_68 : f32 to vector<8x1xf32>
    %228 = arith.divf %226, %227 : vector<8x1xf32>
    %229 = vector.broadcast %221 : vector<8x1xf32> to vector<8x32xf32>
    %230 = arith.subf %215, %229 : vector<8x32xf32>
    %cst_69 = arith.constant 9.99999974E-6 : f32
    %231 = vector.broadcast %cst_69 : f32 to vector<8x1xf32>
    %232 = arith.addf %228, %231 : vector<8x1xf32>
    %233 = math.rsqrt %232 : vector<8x1xf32>
    %234 = vector.broadcast %233 : vector<8x1xf32> to vector<8x32xf32>
    %235 = arith.mulf %230, %234 : vector<8x32xf32>
    %236 = vector.broadcast %216 : vector<1x32xf32> to vector<8x32xf32>
    %237 = arith.mulf %235, %236 : vector<8x32xf32>
    %238 = vector.broadcast %217 : vector<1x32xf32> to vector<8x32xf32>
    %239 = arith.addf %237, %238 : vector<8x32xf32>
    %c0_70 = arith.constant 0 : index
    %c0_71 = arith.constant 0 : index
    %240 = vector.load %arg9[%c0_70, %c0_71] : memref<32x64xf32, #tpu.memory_space<vmem>>, vector<32x64xf32>
    %cst_72 = arith.constant dense<0.000000e+00> : vector<8x64xf32>
    %241 = tpu.matmul %239, %240, %cst_72 {dimension_numbers = #tpu.dot_dimension_numbers<[1], [0], [0], [1], [0, 0, 1, 1], [], []>} : vector<8x32xf32>, vector<32x64xf32>, vector<8x64xf32> -> vector<8x64xf32>
    %242 = vector.extract_strided_slice %2 {offsets = [11, 0], sizes = [1, 64], strides = [1, 1]} : vector<16x128xf32> to vector<1x64xf32>
    %243 = vector.broadcast %242 : vector<1x64xf32> to vector<8x64xf32>
    %244 = arith.addf %241, %243 : vector<8x64xf32>
    %cst_73 = arith.constant 0.000000e+00 : f32
    %245 = vector.broadcast %cst_73 : f32 to vector<8x64xf32>
    %246 = arith.maximumf %244, %245 : vector<8x64xf32>
    %c0_74 = arith.constant 0 : index
    %c0_75 = arith.constant 0 : index
    %247 = vector.load %arg10[%c0_74, %c0_75] : memref<64x32xf32, #tpu.memory_space<vmem>>, vector<64x32xf32>
    %cst_76 = arith.constant dense<0.000000e+00> : vector<8x32xf32>
    %248 = tpu.matmul %246, %247, %cst_76 {dimension_numbers = #tpu.dot_dimension_numbers<[1], [0], [0], [1], [0, 0, 1, 1], [], []>} : vector<8x64xf32>, vector<64x32xf32>, vector<8x32xf32> -> vector<8x32xf32>
    %249 = vector.extract_strided_slice %2 {offsets = [12, 0], sizes = [1, 32], strides = [1, 1]} : vector<16x128xf32> to vector<1x32xf32>
    %250 = vector.broadcast %249 : vector<1x32xf32> to vector<8x32xf32>
    %251 = arith.addf %248, %250 : vector<8x32xf32>
    %252 = arith.addf %215, %251 : vector<8x32xf32>
    %c0_77 = arith.constant 0 : index
    %c0_78 = arith.constant 0 : index
    %253 = vector.load %arg11[%c0_77, %c0_78] : memref<8x32xf32, #tpu.memory_space<vmem>>, vector<8x32xf32>
    tpu.vector_store %arg11[%c0_77, %c0_78], %252 {strides = array<i32>} : memref<8x32xf32, #tpu.memory_space<vmem>>, vector<8x32xf32>,
    return
  }
  func.func @transform_0(%arg0: i32) -> (i32, i32) {
    %c0_i32 = arith.constant 0 : i32
    %c0_i32_0 = arith.constant 0 : i32
    return %arg0, %c0_i32 : i32, i32
  }
  func.func @transform_1(%arg0: i32) -> (i32, i32) {
    %c0_i32 = arith.constant 0 : i32
    %c0_i32_0 = arith.constant 0 : i32
    return %arg0, %c0_i32 : i32, i32
  }
  func.func @transform_2(%arg0: i32) -> (i32, i32) {
    %c0_i32 = arith.constant 0 : i32
    %c0_i32_0 = arith.constant 0 : i32
    %c0_i32_1 = arith.constant 0 : i32
    return %c0_i32, %c0_i32_0 : i32, i32
  }
  func.func @transform_3(%arg0: i32) -> (i32, i32) {
    %c0_i32 = arith.constant 0 : i32
    %c0_i32_0 = arith.constant 0 : i32
    %c0_i32_1 = arith.constant 0 : i32
    return %c0_i32, %c0_i32_0 : i32, i32
  }
  func.func @transform_4(%arg0: i32) -> (i32, i32) {
    %c0_i32 = arith.constant 0 : i32
    %c0_i32_0 = arith.constant 0 : i32
    %c0_i32_1 = arith.constant 0 : i32
    return %c0_i32, %c0_i32_0 : i32, i32
  }
  func.func @transform_5(%arg0: i32) -> (i32, i32) {
    %c0_i32 = arith.constant 0 : i32
    %c0_i32_0 = arith.constant 0 : i32
    %c0_i32_1 = arith.constant 0 : i32
    return %c0_i32, %c0_i32_0 : i32, i32
  }
  func.func @transform_6(%arg0: i32) -> (i32, i32) {
    %c0_i32 = arith.constant 0 : i32
    %c0_i32_0 = arith.constant 0 : i32
    %c0_i32_1 = arith.constant 0 : i32
    return %c0_i32, %c0_i32_0 : i32, i32
  }
  func.func @transform_7(%arg0: i32) -> (i32, i32) {
    %c0_i32 = arith.constant 0 : i32
    %c0_i32_0 = arith.constant 0 : i32
    %c0_i32_1 = arith.constant 0 : i32
    return %c0_i32, %c0_i32_0 : i32, i32
  }
  func.func @transform_8(%arg0: i32) -> (i32, i32) {
    %c0_i32 = arith.constant 0 : i32
    %c0_i32_0 = arith.constant 0 : i32
    %c0_i32_1 = arith.constant 0 : i32
    return %c0_i32, %c0_i32_0 : i32, i32
  }
  func.func @transform_9(%arg0: i32) -> (i32, i32) {
    %c0_i32 = arith.constant 0 : i32
    %c0_i32_0 = arith.constant 0 : i32
    %c0_i32_1 = arith.constant 0 : i32
    return %c0_i32, %c0_i32_0 : i32, i32
  }
  func.func @transform_10(%arg0: i32) -> (i32, i32) {
    %c0_i32 = arith.constant 0 : i32
    %c0_i32_0 = arith.constant 0 : i32
    return %arg0, %c0_i32 : i32, i32
  }
}

</mosaic_0001>

<bundles_post_ra>
// kernel: tpu_custom_call.1
= control target key start
LH: loop header
LB: loop body
LE: loop exit
PB: predicated region body
PF: predicated region fallthrough
CT: control target
= control target key end

     0   :  { %s4211_s0 = inlined_call_operand.hbm [shape: f32[16,32], index: 0, kind: input, shape index: {}]   ;;  %s4212_s1 = inlined_call_operand.vmem [shape: f32[32,32], index: 1, kind: input, shape index: {}]   ;;  %s4213_s2 = inlined_call_operand.hbm [shape: f32[16,128], index: 2, kind: input, shape index: {}]   ;;  %s4214_s3 = inlined_call_operand.vmem [shape: f32[32,96], index: 3, kind: input, shape index: {}]   ;;  %s4215_s4 = inlined_call_operand.vmem [shape: f32[32,32], index: 4, kind: input, shape index: {}]   ;;  %s4216_s5 = inlined_call_operand.hbm [shape: f32[32,32], index: 5, kind: input, shape index: {}]   ;;  %s4217_s6 = inlined_call_operand.hbm [shape: f32[32,64], index: 6, kind: input, shape index: {}]   ;;  %s4218_s7 = inlined_call_operand.hbm [shape: f32[32,32], index: 7, kind: input, shape index: {}]   ;;  %s4219_s8 = inlined_call_operand.hbm [shape: f32[32,64], index: 8, kind: input, shape index: {}]   ;;  %s4220_s9 = inlined_call_operand.vmem [shape: f32[64,32], index: 9, kind: input, shape index: {}]   ;;  %s4221_s10 = inlined_call_operand.hbm [shape: f32[16,32], index: 10, kind: output, shape index: {}]  }
   0x1   :  { %4230 = sst [smem:[#allocation19_spill]] %s4213_s2 }
   0x2   :  { %4231 = sst [smem:[#allocation20_spill]] %s4220_s9 }
   0x3   :  { %4232 = sst [smem:[#allocation21_spill]] %s4221_s10 }
   0x4   :  { %15 = vsyncpa [#allocation3], 0 }
   0x5   :  { %17 = vsyncpa [#allocation3 + $0x1], 0 }
   0x6   :  { %18 = vsyncpa [#allocation6], 0 }
   0x7   :  { %19 = vsyncpa [#allocation9], 0 }
   0x8   :  { %20 = vsyncpa [#allocation12], 0 }
   0x9   :  { %21 = vsyncpa [#allocation4], 0 }
   0xa   :  { %23 = vsyncpa [#allocation4 + $0x1], 0  ;;  %s3580_s13 = smov 0   ;;  %s3582_s14 = smov 0  }
   0xb   :  { %s3584_s15 = smov 0   ;;  %s3586_s16 = smov 0  }
   0xc LB: > { %s3499_s17 = smov [#allocation5]   ;;  %s3601_s19 = sadd.s32 4294967295, %s3497_s16   ;;  %s3497_s16 = sphi %s3586_s16, %s4262_s16   ;;  %s3493_s15 = sphi %s3584_s15, %s4261_s15   ;;  %s3489_s14 = sphi %s3582_s14, %s4260_s14   ;;  %s3485_s13 = sphi %s3580_s13, %s4259_s13  }
   0xd   : > { %s292_s18 = sshll.u32 %s3499_s17, 4  ;;  %p2662_p0 = scmp.ge.s32.totalorder %s3497_s16, 1  ;;  %s3606_s18 = int_to_ptr.vmem [resolvable:$true] %s292_s18 }
   0xe   : > { %p4224_p1 = scmp.eq.s32.totalorder %s3601_s19, 0  ;;  %p280_p2 = scmp.lt.s32.totalorder %s3497_s16, 3 }
   0xf   : > { %s3500_s21 = smov [#allocation8]   ;;  %s3501_s24 = smov [#allocation7]  }
  0x10   : > { %p3608_p3 = pnand %p2662_p0, %p280_p2  ;;  %s324_s22 = sshll.u32 %s3500_s21, 4  ;;  %s3621_s22 = int_to_ptr.vmem [resolvable:$true] %s324_s22 }
  0x11   : > { %s311_s25 = sshll.u32 %s3501_s24, 4  ;;  %s4235_s2 = sld [smem:[#allocation19_spill]]  ;;  %s3623_s25 = int_to_ptr.vmem [resolvable:$true] %s311_s25 }
  0x12   : > { %s4233_s20 = scalar_select %p3608_p3, 1, 0 }
  0x13   : > { %p3084_p5 = pneg %p3608_p3 }
  0x15   : > { %p3617_p6 = pnand %p3084_p5, %p4224_p1 }
  0x17   : > { %s3249_s28 = scalar_lea.hbm %s4235_s2, 256  ;;  %p3633_p8 = pneg %p3617_p6 }
  0x18   : > { %p3250_p7 = scmp.ne.s32.totalorder %s4235_s2, %s3249_s28  ;;  %p3256_p11 = scmp.lt.u32.totalorder %s3249_s28, %s4235_s2 }
  0x1a   : > { %p3252_p9 = pnand %p3633_p8, %p3250_p7 }
  0x1c   : > { %p3253_p10 = pneg %p3252_p9 }
  0x1e   : > { %p3258_p12 = pnand %p3256_p11, %p3253_p10 }
  0x20   : > { %3261 = shalt.err (!%p3258_p12)
}
  0x21   : > { %s3262_s21 = scalar_lea.vmem %s3606_s18, 256  ;;  %p3270_p5 = scmp.lt.s32.totalorder %s3606_s18, %s3606_s18 }
  0x22   : > { %p3263_p13 = scmp.ne.s32.totalorder %s3606_s18, %s3262_s21  ;;  %p3271_p4 = scmp.lt.s32.totalorder %s3262_s21, %s3262_s21 }
  0x24   : > { %p3265_p0 = pnand %p3263_p13, %p3633_p8  ;;  %p3272_p7 = por %p3271_p4, %p3270_p5 }
  0x26   : > { %p3266_p2 = pneg %p3265_p0 }
  0x28   : > { %p3273_p9 = pnand %p3272_p7, %p3266_p2 }
  0x2a   : > { %3276 = shalt.err (!%p3273_p9)
}
  0x2b   : > { %s3502_s24 = smov 128   ;;  %s3503_s26 = smov 8  }
  0x2c   : > { %3087 = dma.hbm_to_vmem [thread:$0]  (!%p3617_p6), %s4235_s2, 256, %s3606_s18, [#allocation6], %s3502_s24, %s3502_s24, %s3503_s26  }
  0x2d   : > { %s3277_s12 = scalar_lea.hbm %s4217_s6, 512 }
  0x2e   : > { %p3278_p4 = scmp.ne.s32.totalorder %s4217_s6, %s3277_s12  ;;  %p3284_p12 = scmp.lt.u32.totalorder %s3277_s12, %s4217_s6 }
  0x30   : > { %p3280_p10 = pnand %p3278_p4, %p3633_p8 }
  0x32   : > { %p3281_p11 = pneg %p3280_p10 }
  0x34   : > { %p3286_p13 = pnand %p3284_p12, %p3281_p11 }
  0x36   : > { %3289 = shalt.err (!%p3286_p13)
}
  0x37   : > { %s3290_s18 = scalar_lea.vmem %s3621_s22, 512  ;;  %p3298_p7 = scmp.lt.s32.totalorder %s3621_s22, %s3621_s22 }
  0x38   : > { %p3291_p0 = scmp.ne.s32.totalorder %s3621_s22, %s3290_s18  ;;  %p3299_p9 = scmp.lt.s32.totalorder %s3290_s18, %s3290_s18 }
  0x3a   : > { %p3293_p2 = pnand %p3291_p0, %p3633_p8  ;;  %p3300_p4 = por %p3299_p9, %p3298_p7 }
  0x3c   : > { %p3294_p5 = pneg %p3293_p2 }
  0x3e   : > { %p3301_p10 = pnand %p3300_p4, %p3294_p5 }
  0x40   : > { %3304 = shalt.err (!%p3301_p10)
}
  0x41   : > { %3093 = dma.hbm_to_vmem [thread:$0]  (!%p3617_p6), %s4217_s6, 512, %s3621_s22, [#allocation9], %s3502_s24, %s3502_s24, %s3503_s26  }
  0x42   : > { %s3305_s29 = scalar_lea.hbm %s4216_s5, 512 }
  0x43   : > { %p3306_p11 = scmp.ne.s32.totalorder %s4216_s5, %s3305_s29  ;;  %p3312_p0 = scmp.lt.u32.totalorder %s3305_s29, %s4216_s5 }
  0x45   : > { %p3308_p12 = pnand %p3306_p11, %p3633_p8 }
  0x47   : > { %p3309_p13 = pneg %p3308_p12 }
  0x49   : > { %p3314_p2 = pnand %p3312_p0, %p3309_p13 }
  0x4b   : > { %3317 = shalt.err (!%p3314_p2)
}
  0x4c   : > { %s3318_s22 = scalar_lea.vmem %s3623_s25, 512  ;;  %p3326_p4 = scmp.lt.s32.totalorder %s3623_s25, %s3623_s25 }
  0x4d   : > { %p3319_p5 = scmp.ne.s32.totalorder %s3623_s25, %s3318_s22  ;;  %p3327_p10 = scmp.lt.s32.totalorder %s3318_s22, %s3318_s22 }
  0x4f   : > { %p3321_p7 = pnand %p3319_p5, %p3633_p8  ;;  %p3328_p11 = por %p3327_p10, %p3326_p4 }
  0x51   : > { %p3322_p9 = pneg %p3321_p7 }
  0x53   : > { %p3329_p12 = pnand %p3328_p11, %p3322_p9 }
  0x55   : > { %3332 = shalt.err (!%p3329_p12)
}
  0x56   : > { %3090 = dma.hbm_to_vmem [thread:$0]  (!%p3617_p6), %s4216_s5, 512, %s3623_s25, [#allocation6], %s3502_s24, %s3502_s24, %s3503_s26  }
  0x57   : > { %s3504_s10 = smov [#allocation10]   ;;  %s3505_s28 = smov [#allocation11]  }
  0x58   : > { %s337_s27 = sshll.u32 %s3504_s10, 4  ;;  %s350_s29 = sshll.u32 %s3505_s28, 4  ;;  %s338_s27 = int_to_ptr.vmem [resolvable:$true] %s337_s27  ;;  %s351_s29 = int_to_ptr.vmem [resolvable:$true] %s350_s29 }
  0x59   : > { %s3333_s17 = scalar_lea.hbm %s4218_s7, 512 }
  0x5a   : > { %p3334_p13 = scmp.ne.s32.totalorder %s4218_s7, %s3333_s17  ;;  %p3340_p5 = scmp.lt.u32.totalorder %s3333_s17, %s4218_s7 }
  0x5c   : > { %p3336_p0 = pnand %p3334_p13, %p3633_p8 }
  0x5e   : > { %p3337_p2 = pneg %p3336_p0 }
  0x60   : > { %p3342_p7 = pnand %p3340_p5, %p3337_p2 }
  0x62   : > { %3345 = shalt.err (!%p3342_p7)
}
  0x63   : > { %s3346_s25 = scalar_lea.vmem %s338_s27, 512  ;;  %p3354_p11 = scmp.lt.s32.totalorder %s338_s27, %s338_s27 }
  0x64   : > { %p3347_p9 = scmp.ne.s32.totalorder %s338_s27, %s3346_s25  ;;  %p3355_p12 = scmp.lt.s32.totalorder %s3346_s25, %s3346_s25 }
  0x66   : > { %p3349_p4 = pnand %p3347_p9, %p3633_p8  ;;  %p3356_p1 = por %p3355_p12, %p3354_p11 }
  0x68   : > { %p3350_p10 = pneg %p3349_p4 }
  0x6a   : > { %p3357_p3 = pnand %p3356_p1, %p3350_p10 }
  0x6c   : > { %3360 = shalt.err (!%p3357_p3)
}
  0x6d   : > { %3096 = dma.hbm_to_vmem [thread:$0]  (!%p3617_p6), %s4218_s7, 512, %s338_s27, [#allocation9], %s3502_s24, %s3502_s24, %s3503_s26  }
  0x6e   : > { %s3361_s30 = scalar_lea.hbm %s4219_s8, 512 }
  0x6f   : > { %p3362_p1 = scmp.ne.s32.totalorder %s4219_s8, %s3361_s30  ;;  %p3368_p0 = scmp.lt.u32.totalorder %s3361_s30, %s4219_s8 }
  0x71   : > { %p3364_p3 = pnand %p3362_p1, %p3633_p8 }
  0x73   : > { %p3365_p13 = pneg %p3364_p3 }
  0x75   : > { %p3370_p2 = pnand %p3368_p0, %p3365_p13 }
  0x77   : > { %3373 = shalt.err (!%p3370_p2)
}
  0x78   : > { %s3374_s18 = scalar_lea.vmem %s351_s29, 512  ;;  %p3382_p4 = scmp.lt.s32.totalorder %s351_s29, %s351_s29 }
  0x79   : > { %p3375_p5 = scmp.ne.s32.totalorder %s351_s29, %s3374_s18  ;;  %p3383_p10 = scmp.lt.s32.totalorder %s3374_s18, %s3374_s18 }
  0x7b   : > { %p3377_p7 = pnand %p3375_p5, %p3633_p8  ;;  %p3384_p11 = por %p3383_p10, %p3382_p4 }
  0x7d   : > { %p3378_p9 = pneg %p3377_p7 }
  0x7f   : > { %p3385_p12 = pnand %p3384_p11, %p3378_p9 }
  0x81   : > { %3388 = shalt.err (!%p3385_p12)
}
  0x82   : > { %3099 = dma.hbm_to_vmem [thread:$0]  (!%p3617_p6), %s4219_s8, 512, %s351_s29, [#allocation12], %s3502_s24, %s3502_s24, %s3503_s26  }
  0x83   : > { %s2661_s23 = sadd.s32 4294967294, %s3497_s16   ;;  %s3753_s11 = sadd.s32 1, %s3497_s16  }
  0x84   : > { %s36_s2 = sadd.s32 1, %s3493_s15  ;;  %s33_s9 = ssub.s32 %s3497_s16, %s3753_s11 }
  0x85   : > { %p43_p8 = scmp.ne.s32.totalorder %s3493_s15, %s3489_s14  ;;  %p34_p1 = scmp.eq.s32.totalorder %s33_s9, 0 }
  0x86   : > { %p44_p3 = scmp.eq.s32.totalorder %s3497_s16, 0  ;;  %p49_p13 = scmp.ne.s32.totalorder %s3489_s14, %s3485_s13 }
  0x87   : > { %p267_p0 = scmp.eq.s32.totalorder %s3601_s19, 1  ;;  %p4237_p5 = scmp.eq.s32.totalorder %s3601_s19, 0 }
  0x88   : > { %s3765_s10 = scalar_select %p34_p1, %s3493_s15, %s36_s2  }
  0x89   : > { %p45_p2 = por %p44_p3, %p43_p8  ;;  %p3769_p7 = por %p4237_p5, %p49_p13 }
  0x8a   : > { %p3773_p6 = por %p267_p0, %p43_p8  ;;  %p273_p9 = scmp.eq.s32.totalorder %s2661_s23, 1 }
  0x8b   : > { %p3113_p4 = scmp.lt.s32.totalorder %s3497_s16, 2  ;;  %s367_s26 = sand.u32 1, %s3493_s15  }
  0x8c   : > { %s4239_s24 = scalar_select %p3773_p6, 1, 0 }
  0x8d   : > { %p3779_p10 = por %p273_p9, %p49_p13  ;;  %s2669_s30 = sshll.u32 %s367_s26, 3 }
  0x8e   : > { %s2670_s12 = sshll.u32 %s3497_s16, 7  ;;  %s371_s18 = scalar_lea.vmem [#allocation2], %s2669_s30 }
  0x8f   : > { %s4240_s29 = scalar_select %p3779_p10, 1, 0 }
  0x90   : > { %s3787_s22 = scalar_lea.hbm %s4211_s0, %s2670_s12  ;;  %s378_s27 = sshll.u32 %s371_s18, 4  ;;  %s3793_s27 = int_to_ptr.vmem [resolvable:$true] %s378_s27 }
  0x91   : > { %p3789_p11 = pnand %p3113_p4, %p45_p2  ;;  %s368_s23 = scalar_lea.sflag [#allocation3], %s367_s26 }
  0x92   : > { %s3389_s2 = scalar_lea.hbm %s3787_s22, 128  ;;  %s3394_s12 = scalar_lea.hbm %s4211_s0, 256 }
  0x93   : > { %p3390_p12 = scmp.ne.s32.totalorder %s3787_s22, %s3389_s2  ;;  %p3391_p8 = pneg %p3789_p11 }
  0x94   : > { %p3395_p13 = scmp.lt.u32.totalorder %s3787_s22, %s4211_s0  ;;  %p3396_p0 = scmp.lt.u32.totalorder %s3394_s12, %s3389_s2 }
  0x95   : > { %p3392_p1 = pnand %p3391_p8, %p3390_p12  ;;  %p3398_p5 = scmp.lt.u32.totalorder %s3389_s2, %s3787_s22 }
  0x96   : > { %p3397_p2 = por %p3396_p0, %p3395_p13 }
  0x97   : > { %p3393_p3 = pneg %p3392_p1 }
  0x98   : > { %p3399_p9 = por %p3398_p5, %p3397_p2 }
  0x9a   : > { %p3400_p4 = pnand %p3399_p9, %p3393_p3 }
  0x9c   : > { %3403 = shalt.err (!%p3400_p4)
}
  0x9d   : > { %s3404_s26 = scalar_lea.vmem %s3793_s27, 128  ;;  %s3506_s18 = smov [#allocation2]  }
  0x9e   : > { %p3405_p12 = scmp.ne.s32.totalorder %s3793_s27, %s3404_s26  ;;  %s3409_s9 = sshll.u32 %s3506_s18, 4  ;;  %s3410_s9 = int_to_ptr.vmem [resolvable:$false] %s3409_s9 }
  0x9f   : > { %s3411_s30 = scalar_lea.vmem %s3410_s9, 256  ;;  %p3412_p6 = scmp.lt.s32.totalorder %s3793_s27, %s3410_s9 }
  0xa0   : > { %p3407_p1 = pnand %p3405_p12, %p3391_p8  ;;  %p3413_p13 = scmp.lt.s32.totalorder %s3411_s30, %s3404_s26 }
  0xa2   : > { %p3408_p10 = pneg %p3407_p1  ;;  %p3414_p0 = por %p3413_p13, %p3412_p6 }
  0xa4   : > { %p3415_p2 = pnand %p3414_p0, %p3408_p10 }
  0xa6   : > { %3418 = shalt.err (!%p3415_p2)
}
  0xa7   : > { %3103 = dma.hbm_to_vmem [thread:$0]  (!%p3789_p11), %s3787_s22, 128, %s3793_s27, %s368_s23  }
  0xa8   : > { %p4242_p3 = scmp.ne.s32.totalorder %s4233_s20, 0 }
  0xa9   : > { %s3823_s2 = sand.u32 (!%p4242_p3), 1, %s3489_s14  }
  0xaa   : > { %396 = sbr.rel (%p4242_p3) target bundleno = 5463 (0x1557), region = 60  ;;  %s4227_s12 = sshll.u32 (!%p4242_p3), %s3823_s2, 3 }
  0xab   : > { %s399_s17 = scalar_lea.sflag (!%p4242_p3), [#allocation3], %s3823_s2  ;;  %s402_s21 = scalar_lea.vmem (!%p4242_p3), [#allocation2], %s4227_s12 }
  0xb1   : > { %3464 = dma.done.wait (%p3769_p7), %s399_s17, 128  }
  0xb2   : > { %3466 = vsyncadd (%p3769_p7), %s399_s17, 4294967168  ;;  %p4243_p6 = scmp.eq.s32.totalorder %s3601_s19, 0 }
  0xb4   : > { %3468 = dma.done.wait (%p4243_p6), [#allocation6], 768   ;;  %p4244_p10 = pmov %p4243_p6 }
  0xb5   : > { %p4245_p11 = pmov %p4243_p6 }
  0xb6   : > { %3470 = vsyncadd (%p4244_p10), [#allocation6], 4294966528 }
  0xb7   : > { %3472 = dma.done.wait (%p4245_p11), [#allocation9], 1024   ;;  %p4246_p8 = pmov %p4243_p6 }
  0xb8   : > { %p4247_p5 = pmov %p4243_p6 }
  0xb9   : > { %3474 = vsyncadd (%p4246_p8), [#allocation9], 4294966272 }
  0xba   : > { %3476 = dma.done.wait (%p4247_p5), [#allocation12], 512   ;;  %p4248_p9 = pmov %p4247_p5 }
  0xbb   : > { %vm480_vm0 = vcmask 261120   ;;  %v470_v0 = vld [vmem:[%s402_s21] sm:$0xff]  ;;  %v507_v9 = vld [vmem:[%s4214_s3 + $0x10] sm:$0xff]  ;;  %v3507_v10 = vmov 0.0|0.0   ;;  %v508_v12 = vld [vmem:[%s4214_s3 + $0x18] sm:$0xff]  ;;  %vm3508_vm1 = vmmov 0   ;;  %v475_v17 = vlaneseq }
  0xbc   : > { %3478 = vsyncadd (%p4248_p9), [#allocation12], 4294966784  ;;  %v481_v1 = vsel %vm480_vm0, %v470_v0, 0.0  ;;  %v505_v7 = vld [vmem:[%s4214_s3] sm:$0xff]  ;;  %v506_v8 = vld [vmem:[%s4214_s3 + $0x8] sm:$0xff]  ;;  %2982 = vmatprep.subr.bf16.mxu1 %v3507_v10  ;;  %v3509_v13 = vmov 0.0   ;;  %v2986_v14 = vpack.c.bf16 %v508_v12, %v507_v9 }
  0xbd   : > { %482 = vadd.xlane.f32.xlu0 %v481_v1  ;;  %v2983_v11 = vpack.c.bf16 %v506_v8, %v505_v7  ;;  %2809 = vmatprep.mubr.msk.f32.mxu1 %vm3508_vm1, %v3509_v13  ;;  %v3867_v19 = vshrl.u32 %v475_v17, 7  ;;  %v3870_v21 = vld [vmem:[#allocation5] sm:$0xff]  ;;  %s3510_s9 = smov 120   ;;  %s3511_s30 = smov 96   ;;  %vm589_vm2 = vcmask 64512   ;;  %v478_v41 = vand.u32 127, %v475_v17 }
  0xbe   : > { %2822 = vmatprep.subr.mxu0 %v3509_v13  ;;  %2824 = vmatprep.mubr.msk.f32.mxu0 %vm3508_vm1, %v3509_v13  ;;  %s3512_s17 = smov 88   ;;  %s4229_s21 = smov 80   ;;  %vm1263_vm4 = vcmask 130048   ;;  %vm1265_vm5 = vcmask 195584   ;;  %vm4018_vm6 = vmpackc.low %vm589_vm2, %vm589_vm2  ;;  %vm2441_vm7 = vcmask 523264  }
  0xbf   : > { %2984 = vmatpush3.bf16.msra.mxu1 %v2983_v11  ;;  %v497_v20 = vsub.s32 0, %v3867_v19  ;;  %v502_v22 = vsub.s32 1, %v3867_v19  ;;  %v511_v29 = vsub.s32 6, %v3867_v19  ;;  %s3514_s20 = smov 112   ;;  %s4228_s28 = smov 72   ;;  %vm479_vm3 = vcmp.le.s32.totalorder %v478_v41, %v3867_v19 }
  0xc0   : > { %2985 = vmatprep.subr.bf16.mxu1 %v3507_v10  ;;  %s3516_s22 = smov 104   ;;  %s3517_s27 = smov 64  }
  0xc1   : > { %v498_v23 = vrot.slane %v3870_v21, %v497_v20  ;;  %v503_v26 = vrot.slane %v3870_v21, %v502_v22  ;;  %v512_v30 = vrot.slane %v3870_v21, %v511_v29  ;;  %s3518_s25 = smov 48   ;;  %s3519_s23 = smov 40  }
  0xc2   : > { %s3520_s26 = smov 56   ;;  %s3521_s18 = smov 8  }
  0xc3   : > { %2987 = vmatpush3.bf16.msra.mxu1 %v2986_v14  ;;  %s2679_s12 = sshll.u32 %s3601_s19, 1  ;;  %p4256_p12 = scmp.ne.s32.totalorder %s4239_s24, 0 }
  0xc4   : > { %2812 = vmatprep.subr.mxu1 %v3509_v13  ;;  %p465_p7 = scmp.lt.s32.totalorder %s2679_s12, 3 }
  0xc6   : > { %s4264_s12 = smov (!%p465_p7, %s2679_s12), 3 }
 0x14a   : > { %v483_v2 = vpop.xlane.xlu0 %482 }
 0x14b   : > { %v485_v3 = vmul.f32 0.03125, %v483_v2 }
 0x14d   : > { %v486_v4 = vsub.f32 %v470_v0, %v485_v3 }
 0x14f   : > { %v487_v5 = vmul.f32 %v486_v4, %v486_v4 }
 0x151   : > { %v488_v6 = vsel %vm480_vm0, %v487_v5, 0.0 }
 0x152   : > { %489 = vadd.xlane.f32.xlu0 %v488_v6 }
 0x1df   : > { %v490_v15 = vpop.xlane.xlu0 %489 }
 0x1e0   : > { %v491_v16 = vmul.f32 0.03125, %v490_v15 }
 0x1e2   : > { %v492_v18 = vadd.f32 1e-05, %v491_v16 }
 0x1e4   : > { %3211 = vrsqrt.f32 %v492_v18 }
 0x1ee   : > { %v3212_v24 = vpop.eup %3211 }
 0x1ef   : > { %v494_v25 = vmul.f32 %v3212_v24, %v486_v4 }
 0x1f1   : > { %v499_v27 = vmul.f32 %v498_v23, %v494_v25 }
 0x1f3   : > { %v3879_v28 = vadd.f32 %v503_v26, %v499_v27 }
 0x1f5   : > { %2810 = vmatmul.mubr.msk.f32.vlgmr.msra.gmra.mrb[0].mxu1 %vm480_vm0, %v3879_v28 }
 0x1f6   : > { %2814 = vmatprep.mubr.msk.f32.mxu1 %vm3508_vm1, %v3509_v13 }
 0x2c8   : > { %v582_v31 = vpop.f32.mrb[0].mxu1 }
 0x2c9   : > { %v3887_v32 = vadd.f32 %v582_v31, %v512_v30  ;;  %v2811_v33 = vpop.f32.mrb[1].mxu1 }
 0x2cb   : > { %752 = vrot.lane.b32.xlu0 %v3887_v32, %s3510_s9  ;;  %587 = vrot.lane.b32.xlu1 %v3887_v32, %s3511_s30 }
 0x2cf   : > { %754 = vrot.lane.b32.xlu1 %v3887_v32, %s3512_s17 }
 0x2d3   : > { %920 = vrot.lane.b32.xlu1 %v3887_v32, %s4229_s21  ;;  %s2680_s21 = sshll.u32 %s4264_s12, 3  ;;  %s4254_s12 = sshll.u32 %s3823_s2, 3 }
 0x2d7   : > { %918 = vrot.lane.b32.xlu1 %v3887_v32, %s3514_s20 }
 0x2db   : > { %1086 = vrot.lane.b32.xlu1 %v3887_v32, %s4228_s28 }
 0x2df   : > { %1084 = vrot.lane.b32.xlu1 %v3887_v32, %s3516_s22 }
 0x33d   : > { %v588_v34 = vpop.permute.xlu1 %587  ;;  %v753_v36 = vpop.permute.xlu0 %752 }
 0x33e   : > { %2813 = vmatpush3.xpose.msk.msra.mxu1 %vm589_vm2, %v588_v34 }
 0x33f   : > { %2817 = vmatprep.subr.mxu1 %v3509_v13 }
 0x341   : > { %2815 = vmatmul.mubr.msk.f32.vlgmr.msra.gmra.mrb[2].mxu1 %vm589_vm2, %v3887_v32  ;;  %v755_v35 = vpop.permute.xlu1 %754 }
 0x342   : > { %2823 = vmatpush3.xpose.msk.msra.mxu0 %vm589_vm2, %v755_v35  ;;  %2819 = vmatprep.mubr.msk.f32.mxu1 %vm3508_vm1, %v3509_v13 }
 0x343   : > { %2832 = vmatprep.subr.mxu0 %v3509_v13 }
 0x345   : > { %2825 = vmatmul.mubr.msk.f32.vlgmr.msra.gmra.mrb[0].mxu0 %vm589_vm2, %v753_v36  ;;  %v921_v37 = vpop.permute.xlu1 %920 }
 0x346   : > { %2833 = vmatpush3.xpose.msk.msra.mxu0 %vm589_vm2, %v921_v37  ;;  %2834 = vmatprep.mubr.msk.f32.mxu0 %vm3508_vm1, %v3509_v13  ;;  %v1267_v37 = vld [vmem:[%s4215_s4] sm:$0xff] }
 0x347   : > { %2842 = vmatprep.subr.mxu0 %v3509_v13 }
 0x349   : > { %v919_v38 = vpop.permute.xlu1 %918 }
 0x34a   : > { %2835 = vmatmul.mubr.msk.f32.vlgmr.msra.gmra.mrb[2].mxu0 %vm589_vm2, %v919_v38  ;;  %v1268_v38 = vld [vmem:[%s4215_s4 + $0x8] sm:$0xff] }
 0x34b   : > { %2844 = vmatprep.mubr.msk.f32.mxu0 %vm3508_vm1, %v3509_v13 }
 0x34d   : > { %v1087_v39 = vpop.permute.xlu1 %1086 }
 0x34e   : > { %2843 = vmatpush3.xpose.msk.msra.mxu0 %vm589_vm2, %v1087_v39  ;;  %v2989_v39 = vpack.c.bf16 %v1268_v38, %v1267_v37 }
 0x34f   : > { %2988 = vmatprep.subr.bf16.mxu0 %v3507_v10 }
 0x351   : > { %v1085_v40 = vpop.permute.xlu1 %1084 }
 0x352   : > { %2845 = vmatmul.mubr.msk.f32.vlgmr.msra.gmra.mrb[4].mxu0 %vm589_vm2, %v1085_v40 }
 0x353   : > { %2860 = vmatprep.mubr.msk.f32.mxu0 %vm3508_vm1, %v3509_v13  ;;  %2990 = vmatpush3.bf16.msra.mxu0 %v2989_v39 }
 0x354   : > { %2991 = vmatprep.subr.bf16.mxu0 %v3507_v10 }
 0x414   : > { %v660_v42 = vpop.f32.mrb[2].mxu1 }
 0x415   : > { %v664_v43 = vsel %vm479_vm3, %v660_v42, -1e+30  ;;  %v2816_v44 = vpop.f32.mrb[3].mxu1  ;;  %v1269_v42 = vld [vmem:[%s4215_s4 + $0x10] sm:$0xff] }
 0x416   : > { %v665_v45 = vsel %vm589_vm2, %v664_v43, -inf }
 0x417   : > { %666 = vmax.xlane.f32.xlu1 %v665_v45 }
 0x418   : > { %v826_v46 = vpop.f32.mrb[0].mxu0 }
 0x419   : > { %v830_v47 = vsel %vm479_vm3, %v826_v46, -1e+30  ;;  %v2826_v48 = vpop.f32.mrb[1].mxu0 }
 0x41a   : > { %v831_v49 = vsel %vm589_vm2, %v830_v47, -inf }
 0x41b   : > { %832 = vmax.xlane.f32.xlu0 %v831_v49 }
 0x41d   : > { %v992_v50 = vpop.f32.mrb[2].mxu0 }
 0x41e   : > { %v996_v51 = vsel %vm479_vm3, %v992_v50, -1e+30  ;;  %v2836_v52 = vpop.f32.mrb[3].mxu0 }
 0x41f   : > { %v997_v53 = vsel %vm589_vm2, %v996_v51, -inf }
 0x420   : > { %998 = vmax.xlane.f32.xlu1 %v997_v53 }
 0x425   : > { %v1158_v54 = vpop.f32.mrb[4].mxu0 }
 0x426   : > { %v1162_v55 = vsel %vm479_vm3, %v1158_v54, -1e+30  ;;  %v2846_v56 = vpop.f32.mrb[5].mxu0 }
 0x427   : > { %v1163_v57 = vsel %vm589_vm2, %v1162_v55, -inf }
 0x428   : > { %1164 = vmax.xlane.f32.xlu0 %v1163_v57  ;;  %v1273_v57 = vsub.s32 7, %v3867_v19 }
 0x431   : > { %676 = vrot.lane.b32.xlu1 %v3887_v32, %s3517_s27  ;;  %s3522_s27 = smov 16  }
 0x4a4   : > { %v667_v58 = vpop.xlane.xlu1 %666 }
 0x4a5   : > { %v668_v59 = vsub.f32 %v664_v43, %v667_v58  ;;  %v1270_v43 = vld [vmem:[%s4215_s4 + $0x18] sm:$0xff]  ;;  %v1274_v58 = vrot.slane %v3870_v21, %v1273_v57 }
 0x4a6   : > { %v2992_v44 = vpack.c.bf16 %v1270_v43, %v1269_v42 }
 0x4a7   : > { %v669_v60 = vmul.f32 1.442695, %v668_v59 }
 0x4a8   : > { %v833_v61 = vpop.xlane.xlu0 %832  ;;  %2993 = vmatpush3.bf16.msra.mxu0 %v2992_v44 }
 0x4a9   : > { %3213 = vpow2.f32 %v669_v60  ;;  %v834_v62 = vsub.f32 %v830_v47, %v833_v61 }
 0x4ab   : > { %v835_v63 = vmul.f32 1.442695, %v834_v62 }
 0x4ad   : > { %3215 = vpow2.f32 %v835_v63  ;;  %v999_v0 = vpop.xlane.xlu1 %998 }
 0x4ae   : > { %v1000_v1 = vsub.f32 %v996_v51, %v999_v0  ;;  %v1453_v0 = vld [vmem:[#allocation8] sm:$0xff] }
 0x4b0   : > { %v1001_v2 = vmul.f32 1.442695, %v1000_v1  ;;  %v1454_v1 = vld [vmem:[#allocation8 + $0x8] sm:$0xff] }
 0x4b1   : > { %v677_v3 = vpop.permute.xlu1 %676 }
 0x4b2   : > { %3217 = vpow2.f32 %v1001_v2  ;;  %2818 = vmatpush3.msra.mxu1 %v677_v3  ;;  %v3000_v2 = vpack.c.bf16 %v1454_v1, %v1453_v0 }
 0x4b3   : > { %v3214_v4 = vpop.eup %3213  ;;  %2827 = vmatprep.subr.mxu1 %v3509_v13 }
 0x4b4   : > { %v671_v5 = vsel %vm589_vm2, %v3214_v4, 0.0  ;;  %3001 = vmatprep.subr.bf16.mxu0 %v3000_v2 }
 0x4b5   : > { %v1165_v6 = vpop.xlane.xlu0 %1164  ;;  %672 = vadd.xlane.f32.xlu1 %v671_v5 }
 0x4b6   : > { %v1166_v7 = vsub.f32 %v1162_v55, %v1165_v6 }
 0x4b7   : > { %v3216_v8 = vpop.eup %3215 }
 0x4b8   : > { %v1167_v9 = vmul.f32 1.442695, %v1166_v7  ;;  %v837_v11 = vsel %vm589_vm2, %v3216_v8, 0.0 }
 0x4b9   : > { %838 = vadd.xlane.f32.xlu0 %v837_v11 }
 0x4ba   : > { %3219 = vpow2.f32 %v1167_v9  ;;  %v1456_v9 = vld [vmem:[#allocation8 + $0x18] sm:$0xff] }
 0x4bc   : > { %v3218_v12 = vpop.eup %3217 }
 0x4bd   : > { %v1003_v14 = vsel %vm589_vm2, %v3218_v12, 0.0 }
 0x4be   : > { %1004 = vadd.xlane.f32.xlu1 %v1003_v14  ;;  %v1372_v14 = vld [vmem:[#allocation7] sm:$0xff] }
 0x4c4   : > { %v3220_v15 = vpop.eup %3219 }
 0x4c5   : > { %v1169_v16 = vsel %vm589_vm2, %v3220_v15, 0.0 }
 0x4c6   : > { %1170 = vadd.xlane.f32.xlu0 %v1169_v16 }
 0x4cf   : > { %1008 = vrot.lane.b32.xlu1 %v3887_v32, %s3518_s25  ;;  %s3523_s25 = smov 24  }
 0x4d3   : > { %1174 = vrot.lane.b32.xlu1 %v3887_v32, %s3519_s23 }
 0x4dc   : > { %842 = vrot.lane.b32.xlu0 %v3887_v32, %s3520_s26  ;;  %s468_s26 = scalar_lea.vmem %s4212_s1, %s2680_s21  ;;  %s463_s21 = scalar_lea.vmem [#allocation13], %s4254_s12 }
 0x4dd   : > { %v471_v11 = vld [vmem:[%s468_s26] sm:$0xff]  ;;  %s2531_s28 = sshll.u32 %s463_s21, 4  ;;  %s4168_s28 = int_to_ptr.vmem [resolvable:$true] %s2531_s28 }
 0x542   : > { %v673_v17 = vpop.xlane.xlu1 %672 }
 0x543   : > { %3221 = vrcp.f32 %v673_v17  ;;  %v1374_v17 = vld [vmem:[#allocation7 + $0x10] sm:$0xff] }
 0x546   : > { %v839_v18 = vpop.xlane.xlu0 %838 }
 0x547   : > { %3223 = vrcp.f32 %v839_v18  ;;  %v1375_v18 = vld [vmem:[#allocation7 + $0x18] sm:$0xff] }
 0x54b   : > { %v1005_v23 = vpop.xlane.xlu1 %1004 }
 0x54c   : > { %3225 = vrcp.f32 %v1005_v23  ;;  %v2998_v23 = vpack.c.bf16 %v1375_v18, %v1374_v17 }
 0x54d   : > { %v3222_v24 = vpop.eup %3221 }
 0x54e   : > { %v675_v25 = vmul.f32 %v3222_v24, %v3214_v4 }
 0x54f   : > { %v1009_v30 = vpop.permute.xlu1 %1008 }
 0x550   : > { %2820 = vmatmul.mubr.msk.f32.vlgmr.msra.gmra.mrb[4].mxu1 %vm589_vm2, %v675_v25 }
 0x551   : > { %2829 = vmatprep.mubr.msk.f32.mxu1 %vm3508_vm1, %v3509_v13  ;;  %v3224_v27 = vpop.eup %3223 }
 0x552   : > { %v841_v29 = vmul.f32 %v3224_v27, %v3216_v8  ;;  %v1455_v8 = vld [vmem:[#allocation8 + $0x10] sm:$0xff]  ;;  %v1364_v27 = vsub.s32 2, %v3867_v19 }
 0x553   : > { %v1171_v26 = vpop.xlane.xlu0 %1170  ;;  %v1175_v34 = vpop.permute.xlu1 %1174 }
 0x554   : > { %3227 = vrcp.f32 %v1171_v26 }
 0x556   : > { %v3226_v32 = vpop.eup %3225 }
 0x557   : > { %v843_v31 = vpop.permute.xlu0 %842  ;;  %v1007_v33 = vmul.f32 %v3226_v32, %v3218_v12  ;;  %v472_v12 = vld [vmem:[%s468_s26 + $0x8] sm:$0xff] }
 0x558   : > { %2828 = vmatpush3.msra.mxu1 %v843_v31 }
 0x559   : > { %2830 = vmatmul.mubr.msk.f32.vlgmr.msra.gmra.mrb[6].mxu1 %vm589_vm2, %v841_v29  ;;  %2837 = vmatprep.subr.mxu1 %v3509_v13  ;;  %v1369_v29 = vsub.s32 3, %v3867_v19 }
 0x55a   : > { %2838 = vmatpush3.msra.mxu1 %v1009_v30  ;;  %2839 = vmatprep.mubr.msk.f32.mxu1 %vm3508_vm1, %v3509_v13  ;;  %v1365_v30 = vrot.slane %v3870_v21, %v1364_v27 }
 0x55b   : > { %2847 = vmatprep.subr.mxu1 %v3509_v13 }
 0x55d   : > { %2840 = vmatmul.mubr.msk.f32.vlgmr.msra.gmra.mrb[8].mxu1 %vm589_vm2, %v1007_v33  ;;  %v1370_v33 = vrot.slane %v3870_v21, %v1369_v29 }
 0x55e   : > { %v3228_v35 = vpop.eup %3227  ;;  %2848 = vmatpush3.msra.mxu1 %v1175_v34  ;;  %2849 = vmatprep.mubr.msk.f32.mxu1 %vm3508_vm1, %v3509_v13 }
 0x55f   : > { %v1173_v36 = vmul.f32 %v3228_v35, %v3220_v15  ;;  %2994 = vmatprep.subr.bf16.mxu1 %v3507_v10  ;;  %v1373_v15 = vld [vmem:[#allocation7 + $0x8] sm:$0xff] }
 0x560   : > { %v2995_v16 = vpack.c.bf16 %v1373_v15, %v1372_v14 }
 0x561   : > { %2850 = vmatmul.mubr.msk.f32.vlgmr.msra.gmra.mrb[10].mxu1 %vm589_vm2, %v1173_v36  ;;  %v4011_v36 = vld [vmem:[#allocation5 + $0x8] sm:$0xff] }
 0x562   : > { %2871 = vmatprep.mubr.msk.f32.mxu1 %vm3508_vm1, %v3509_v13  ;;  %2996 = vmatpush3.bf16.msra.mxu1 %v2995_v16  ;;  %v1460_v37 = vrot.slane %v4011_v36, %v502_v22 }
 0x563   : > { %2997 = vmatprep.subr.bf16.mxu1 %v3507_v10 }
 0x566   : > { %2999 = vmatpush3.bf16.msra.mxu1 %v2998_v23 }
 0x567   : > { %3008 = vmatprep.subr.bf16.mxu1 %v3507_v10 }
 0x623   : > { %v748_v40 = vpop.f32.mrb[4].mxu1 }
 0x624   : > { %v2821_v41 = vpop.f32.mrb[5].mxu1 }
 0x62c   : > { %v914_v45 = vpop.f32.mrb[6].mxu1 }
 0x62d   : > { %1251 = vrot.lane.b32.xlu0 %v914_v45, %s3521_s18  ;;  %v2831_v46 = vpop.f32.mrb[7].mxu1 }
 0x630   : > { %v1080_v47 = vpop.f32.mrb[8].mxu1 }
 0x631   : > { %1255 = vrot.lane.b32.xlu1 %v1080_v47, %s3522_s27  ;;  %v2841_v48 = vpop.f32.mrb[9].mxu1  ;;  %v1379_v47 = vrot.slane %v4011_v36, %v497_v20 }
 0x634   : > { %v1246_v49 = vpop.f32.mrb[10].mxu1 }
 0x635   : > { %1259 = vrot.lane.b32.xlu0 %v1246_v49, %s3523_s25  ;;  %v2851_v50 = vpop.f32.mrb[11].mxu1 }
 0x69f   : > { %v1252_v51 = vpop.permute.xlu0 %1251 }
 0x6a0   : > { %v1262_v53 = vsel %vm589_vm2, %v748_v40, %v1252_v51 }
 0x6a3   : > { %v1256_v52 = vpop.permute.xlu1 %1255 }
 0x6a4   : > { %v1264_v54 = vsel %vm1263_vm4, %v1262_v53, %v1256_v52 }
 0x6a7   : > { %v1260_v55 = vpop.permute.xlu0 %1259 }
 0x6a8   : > { %v1266_v56 = vsel %vm1265_vm5, %v1264_v54, %v1260_v55 }
 0x6a9   : > { %2861 = vmatmul.mubr.msk.f32.vlgmr.msra.gmra.mrb[6].mxu0 %vm480_vm0, %v1266_v56 }
 0x6aa   : > { %3003 = vmatpush3.bf16.msra.mxu0 %v3000_v2  ;;  %2882 = vmatprep.mubr.msk.f32.mxu0 %vm480_vm0, %v471_v11 }
 0x77c   : > { %v1344_v59 = vpop.f32.mrb[6].mxu0 }
 0x77d   : > { %v1345_v60 = vadd.f32 %v1344_v59, %v1274_v58  ;;  %v2862_v61 = vpop.f32.mrb[7].mxu0 }
 0x77f   : > { %v1348_v62 = vadd.f32 %v1345_v60, %v3879_v28  ;;  %v3004_v28 = vpack.c.bf16 %v1456_v9, %v1455_v8 }
 0x781   : > { %v1349_v63 = vsel %vm480_vm0, %v1348_v62, 0.0  ;;  %3005 = vmatprep.subr.bf16.mxu0 %v3004_v28 }
 0x782   : > { %1350 = vadd.xlane.f32.xlu1 %v1349_v63  ;;  %3007 = vmatpush3.bf16.msra.mxu0 %v3004_v28 }
 0x783   : > { %3012 = vmatprep.subr.bf16.mxu0 %v3507_v10 }
 0x785   : > { %2883 = vmatmul.mubr.msk.f32.vlgmr.msra.gmra.mrb[8].mxu0 %vm480_vm0, %v472_v12 }
 0x786   : > { %2896 = vmatprep.mubr.msk.f32.mxu0 %vm3508_vm1, %v3509_v13 }
 0x80f   : > { %v1351_v3 = vpop.xlane.xlu1 %1350 }
 0x810   : > { %v1352_v4 = vmul.f32 0.03125, %v1351_v3 }
 0x812   : > { %v1353_v5 = vsub.f32 %v1348_v62, %v1352_v4 }
 0x814   : > { %v1354_v6 = vmul.f32 %v1353_v5, %v1353_v5 }
 0x816   : > { %v1355_v7 = vsel %vm480_vm0, %v1354_v6, 0.0 }
 0x817   : > { %1356 = vadd.xlane.f32.xlu0 %v1355_v7 }
 0x858   : > { %v2884_v38 = vpop.f32.mrb[8].mxu0 }
 0x859   : > { %v1539_v39 = vadd.f32 %v2884_v38, %v1460_v37  ;;  %v1533_v40 = vpop.f32.mrb[9].mxu0 }
 0x85a   : > { %v1534_v41 = vadd.f32 %v1533_v40, %v1460_v37 }
 0x85c   : > { %v4022_v43 = vpack.i.bf16 %v1539_v39, %v1534_v41  ;;  %v3009_v44 = vpack.c.bf16 %v1539_v39, %v1534_v41 }
 0x85e   : > { %3177 = vrot.lane.b32.xlu0 %v4022_v43, %s3510_s9 }
 0x8a4   : > { %v1357_v24 = vpop.xlane.xlu0 %1356 }
 0x8a5   : > { %v1358_v25 = vmul.f32 0.03125, %v1357_v24 }
 0x8a7   : > { %v1359_v26 = vadd.f32 1e-05, %v1358_v25 }
 0x8a9   : > { %3229 = vrsqrt.f32 %v1359_v26 }
 0x8b3   : > { %v3230_v31 = vpop.eup %3229 }
 0x8b4   : > { %v1361_v32 = vmul.f32 %v3230_v31, %v1353_v5 }
 0x8b6   : > { %v1366_v34 = vmul.f32 %v1365_v30, %v1361_v32 }
 0x8b8   : > { %v4005_v35 = vadd.f32 %v1370_v33, %v1366_v34 }
 0x8ba   : > { %2872 = vmatmul.mubr.msk.f32.vlgmr.msra.gmra.mrb[12].mxu1 %vm480_vm0, %v4005_v35 }
 0x8bb   : > { %2889 = vmatprep.mubr.msk.f32.mxu1 %vm3508_vm1, %v3509_v13  ;;  %3011 = vmatpush3.bf16.xpose.msk.msra.mxu1 %vm4018_vm6, %v3009_v44 }
 0x8bc   : > { %3015 = vmatprep.subr.bf16.mxu1 %v3507_v10 }
 0x8d0   : > { %v3178_v22 = vpop.permute.xlu0 %3177 }
 0x8d1   : > { %v3180_v45 = vunpack.i.h.bf16 %v3178_v22  ;;  %v3179_v46 = vunpack.i.l.bf16 %v3178_v22 }
 0x8d3   : > { %v3016_v49 = vpack.c.bf16 %v3180_v45, %v3179_v46 }
 0x98d   : > { %v1449_v48 = vpop.f32.mrb[12].mxu1 }
 0x98e   : > { %v4032_v50 = vadd.f32 %v1449_v48, %v1379_v47  ;;  %v2873_v51 = vpop.f32.mrb[13].mxu1 }
 0x990   : > { %1711 = vrot.lane.b32.xlu1 %v4032_v50, %s3510_s9  ;;  %2890 = vmatmul.mubr.msk.f32.vlgmr.msra.gmra.mrb[14].mxu1 %vm589_vm2, %v4032_v50  ;;  %s4251_s9 = smov 80  }
 0x991   : > { %3018 = vmatpush3.bf16.xpose.msk.msra.mxu1 %vm4018_vm6, %v3016_v49  ;;  %2903 = vmatprep.mubr.msk.f32.mxu1 %vm3508_vm1, %v3509_v13 }
 0x992   : > { %3026 = vmatprep.subr.bf16.mxu1 %v3507_v10 }
 0xa02   : > { %v1712_v20 = vpop.permute.xlu1 %1711 }
 0xa03   : > { %2904 = vmatmul.mubr.msk.f32.vlgmr.msra.gmra.mrb[16].mxu1 %vm589_vm2, %v1712_v20 }
 0xa04   : > { %2924 = vmatprep.mubr.msk.f32.mxu1 %vm3508_vm1, %v3509_v13 }
 0xa63   : > { %v1617_v52 = vpop.f32.mrb[14].mxu1 }
 0xa64   : > { %v2891_v53 = vpop.f32.mrb[15].mxu1  ;;  %v1621_v54 = vsel %vm1263_vm4, %v1617_v52, -inf }
 0xa65   : > { %1622 = vmax.xlane.f32.xlu1 %v1621_v54 }
 0xa76   : > { %3187 = vrot.lane.b32.xlu1 %v4022_v43, %s3512_s17  ;;  %s3419_s17 = scalar_lea.vmem %s4168_s28, 128 }
 0xa77   : > { %p3420_p4 = scmp.ne.s32.totalorder %s4168_s28, %s3419_s17 }
 0xa79   : > { %p3421_p1 = pnand %p3420_p4, %p4256_p12 }
 0xa7b   : > { %p3422_p13 = pneg %p3421_p1 }
 0xad6   : > { %v1789_v55 = vpop.f32.mrb[16].mxu1 }
 0xad7   : > { %v2905_v56 = vpop.f32.mrb[17].mxu1  ;;  %v1793_v57 = vsel %vm1263_vm4, %v1789_v55, -inf }
 0xad8   : > { %1794 = vmax.xlane.f32.xlu0 %v1793_v57 }
 0xaf2   : > { %v1623_v58 = vpop.xlane.xlu1 %1622 }
 0xaf3   : > { %v1624_v59 = vsub.f32 %v1617_v52, %v1623_v58 }
 0xaf5   : > { %v1625_v60 = vmul.f32 1.442695, %v1624_v59 }
 0xaf6   : > { %v3188_v8 = vpop.permute.xlu1 %3187 }
 0xaf7   : > { %3231 = vpow2.f32 %v1625_v60  ;;  %v3190_v28 = vunpack.i.h.bf16 %v3188_v8  ;;  %v3189_v11 = vunpack.i.l.bf16 %v3188_v8  ;;  %v2242_v8 = vld [vmem:[#allocation10] sm:$0xff] }
 0xaf9   : > { %v3020_v15 = vpack.c.bf16 %v3190_v28, %v3189_v11  ;;  %v2244_v28 = vld [vmem:[#allocation10 + $0x10] sm:$0xff] }
 0xb01   : > { %v3232_v61 = vpop.eup %3231 }
 0xb02   : > { %v1627_v62 = vsel %vm1263_vm4, %v3232_v61, 0.0 }
 0xb03   : > { %1628 = vadd.xlane.f32.xlu0 %v1627_v62 }
 0xb19   : > { %3182 = vrot.lane.b32.xlu0 %v4022_v43, %s3511_s30  ;;  %s4252_s30 = smov 72  }
 0xb1d   : > { %1883 = vrot.lane.b32.xlu0 %v4032_v50, %s3514_s20 }
 0xb65   : > { %v1795_v63 = vpop.xlane.xlu0 %1794 }
 0xb66   : > { %v1796_v0 = vsub.f32 %v1789_v55, %v1795_v63 }
 0xb68   : > { %v1797_v1 = vmul.f32 1.442695, %v1796_v0 }
 0xb6a   : > { %3233 = vpow2.f32 %v1797_v1 }
 0xb74   : > { %v3234_v2 = vpop.eup %3233 }
 0xb75   : > { %v1799_v3 = vsel %vm1263_vm4, %v3234_v2, 0.0 }
 0xb76   : > { %1800 = vadd.xlane.f32.xlu1 %v1799_v3 }
 0xb87   : > { %3192 = vrot.lane.b32.xlu1 %v4022_v43, %s3514_s20  ;;  %s3524_s20 = smov [#allocation13]  }
 0xb90   : > { %v1629_v4 = vpop.xlane.xlu0 %1628 }
 0xb91   : > { %3235 = vrcp.f32 %v1629_v4 }
 0xb94   : > { %v3183_v5 = vpop.permute.xlu0 %3182 }
 0xb95   : > { %v3185_v6 = vunpack.i.h.bf16 %v3183_v5  ;;  %v3184_v7 = vunpack.i.l.bf16 %v3183_v5 }
 0xb97   : > { %v3013_v9 = vpack.c.bf16 %v3185_v6, %v3184_v7 }
 0xb98   : > { %v1884_v30 = vpop.permute.xlu0 %1883 }
 0xb99   : > { %3014 = vmatpush3.bf16.msra.mxu0 %v3013_v9  ;;  %v2243_v9 = vld [vmem:[#allocation10 + $0x8] sm:$0xff] }
 0xb9a   : > { %3019 = vmatprep.subr.bf16.mxu0 %v3507_v10  ;;  %v3037_v11 = vpack.c.bf16 %v2243_v9, %v2242_v8 }
 0xb9b   : > { %v3236_v12 = vpop.eup %3235 }
 0xb9c   : > { %v1631_v14 = vmul.f32 %v3236_v12, %v3232_v61  ;;  %v2245_v12 = vld [vmem:[#allocation10 + $0x18] sm:$0xff] }
 0xb9e   : > { %2897 = vmatmul.mubr.msk.f32.vlgmr.msra.gmra.mrb[10].mxu0 %vm1263_vm4, %v1631_v14  ;;  %v3040_v14 = vpack.c.bf16 %v2245_v12, %v2244_v28 }
 0xb9f   : > { %3021 = vmatpush3.bf16.msra.mxu0 %v3020_v15  ;;  %2910 = vmatprep.mubr.msk.f32.mxu0 %vm3508_vm1, %v3509_v13 }
 0xba0   : > { %3022 = vmatprep.subr.bf16.mxu0 %v3507_v10 }
 0xc03   : > { %v1801_v16 = vpop.xlane.xlu1 %1800 }
 0xc04   : > { %3237 = vrcp.f32 %v1801_v16 }
 0xc07   : > { %v3193_v17 = vpop.permute.xlu1 %3192 }
 0xc08   : > { %v3195_v18 = vunpack.i.h.bf16 %v3193_v17  ;;  %v3194_v23 = vunpack.i.l.bf16 %v3193_v17 }
 0xc0a   : > { %v3023_v26 = vpack.c.bf16 %v3195_v18, %v3194_v23 }
 0xc0e   : > { %v3238_v24 = vpop.eup %3237 }
 0xc0f   : > { %v1803_v25 = vmul.f32 %v3238_v24, %v3234_v2 }
 0xc11   : > { %2911 = vmatmul.mubr.msk.f32.vlgmr.msra.gmra.mrb[12].mxu0 %vm1263_vm4, %v1803_v25 }
 0xc12   : > { %3025 = vmatpush3.bf16.xpose.msk.msra.mxu0 %vm4018_vm6, %v3023_v26  ;;  %2917 = vmatprep.mubr.msk.f32.mxu0 %vm3508_vm1, %v3509_v13 }
 0xc13   : > { %3033 = vmatprep.subr.bf16.mxu0 %v3507_v10 }
 0xc19   : > { %2918 = vmatmul.mubr.msk.f32.vlgmr.msra.gmra.mrb[14].mxu0 %vm589_vm2, %v1884_v30  ;;  %v2249_v30 = vrot.slane %v4011_v36, %v1364_v27  ;;  %v2348_v27 = vld [vmem:[#allocation11 + $0x8] sm:$0xff] }
 0xc1a   : > { %2938 = vmatprep.mubr.msk.f32.mxu0 %vm3508_vm1, %v3509_v13 }
 0xc71   : > { %v4072_v31 = vpop.f32.mrb[10].mxu0 }
 0xc72   : > { %v2898_v32 = vpop.f32.mrb[11].mxu0 }
 0xce4   : > { %v1879_v33 = vpop.f32.mrb[12].mxu0 }
 0xce5   : > { %v2912_v34 = vpop.f32.mrb[13].mxu0 }
 0xcec   : > { %v1961_v37 = vpop.f32.mrb[14].mxu0 }
 0xced   : > { %v2919_v38 = vpop.f32.mrb[15].mxu0  ;;  %v1965_v39 = vsel %vm1263_vm4, %v1961_v37, -inf }
 0xcee   : > { %1966 = vmax.xlane.f32.xlu1 %v1965_v39 }
 0xcff   : > { %3202 = vrot.lane.b32.xlu1 %v4022_v43, %s3516_s22 }
 0xd03   : > { %2055 = vrot.lane.b32.xlu1 %v4032_v50, %s3516_s22  ;;  %s4253_s22 = sld [smem:[#allocation20_spill]] }
 0xd7b   : > { %v1967_v40 = vpop.xlane.xlu1 %1966 }
 0xd7c   : > { %v1968_v41 = vsub.f32 %v1961_v37, %v1967_v40 }
 0xd7e   : > { %v1969_v44 = vmul.f32 1.442695, %v1968_v41 }
 0xd7f   : > { %v3203_v20 = vpop.permute.xlu1 %3202 }
 0xd80   : > { %3239 = vpow2.f32 %v1969_v44  ;;  %v3205_v52 = vunpack.i.h.bf16 %v3203_v20  ;;  %v3204_v53 = vunpack.i.l.bf16 %v3203_v20  ;;  %v2347_v44 = vld [vmem:[#allocation11] sm:$0xff]  ;;  %v2432_v20 = vld [vmem:[%s4253_s22 + $0x18] sm:$0xff] }
 0xd82   : > { %v3030_v55 = vpack.c.bf16 %v3205_v52, %v3204_v53  ;;  %v2433_v52 = vld [vmem:[%s4253_s22 + $0x20] sm:$0xff]  ;;  %v2434_v53 = vld [vmem:[%s4253_s22 + $0x28] sm:$0xff] }
 0xd83   : > { %v2056_v56 = vpop.permute.xlu1 %2055 }
 0xd8a   : > { %v3240_v22 = vpop.eup %3239 }
 0xd8b   : > { %v1971_v45 = vsel %vm1263_vm4, %v3240_v22, 0.0 }
 0xd8c   : > { %1972 = vadd.xlane.f32.xlu0 %v1971_v45  ;;  %v2350_v45 = vld [vmem:[#allocation11 + $0x18] sm:$0xff] }
 0xda2   : > { %3197 = vrot.lane.b32.xlu0 %v4022_v43, %s4251_s9  ;;  %s4255_s9 = sld [smem:[#allocation21_spill]] }
 0xe19   : > { %v1973_v46 = vpop.xlane.xlu0 %1972 }
 0xe1a   : > { %3241 = vrcp.f32 %v1973_v46 }
 0xe1d   : > { %v3198_v47 = vpop.permute.xlu0 %3197 }
 0xe1e   : > { %v3200_v48 = vunpack.i.h.bf16 %v3198_v47  ;;  %v3199_v49 = vunpack.i.l.bf16 %v3198_v47  ;;  %v2429_v47 = vld [vmem:[%s4253_s22] sm:$0xff] }
 0xe20   : > { %v3027_v51 = vpack.c.bf16 %v3200_v48, %v3199_v49  ;;  %v2430_v48 = vld [vmem:[%s4253_s22 + $0x8] sm:$0xff]  ;;  %v2431_v49 = vld [vmem:[%s4253_s22 + $0x10] sm:$0xff] }
 0xe22   : > { %3028 = vmatpush3.bf16.msra.mxu1 %v3027_v51  ;;  %v3049_v51 = vpack.c.bf16 %v2430_v48, %v2429_v47 }
 0xe23   : > { %3029 = vmatprep.subr.bf16.mxu1 %v3507_v10 }
 0xe24   : > { %v3242_v50 = vpop.eup %3241 }
 0xe25   : > { %v1975_v54 = vmul.f32 %v3242_v50, %v3240_v22  ;;  %v3043_v22 = vpack.c.bf16 %v2348_v27, %v2347_v44  ;;  %v3052_v50 = vpack.c.bf16 %v2432_v20, %v2431_v49 }
 0xe27   : > { %2925 = vmatmul.mubr.msk.f32.vlgmr.msra.gmra.mrb[18].mxu1 %vm1263_vm4, %v1975_v54  ;;  %v3055_v54 = vpack.c.bf16 %v2434_v53, %v2433_v52 }
 0xe28   : > { %2931 = vmatprep.mubr.msk.f32.mxu1 %vm3508_vm1, %v3509_v13 }
 0xe2b   : > { %3032 = vmatpush3.bf16.xpose.msk.msra.mxu1 %vm4018_vm6, %v3030_v55 }
 0xe2c   : > { %3042 = vmatprep.subr.bf16.mxu1 %v3507_v10 }
 0xe32   : > { %2932 = vmatmul.mubr.msk.f32.vlgmr.msra.gmra.mrb[20].mxu1 %vm589_vm2, %v2056_v56 }
 0xe33   : > { %2960 = vmatprep.mubr.msk.f32.mxu1 %vm3508_vm1, %v3509_v13  ;;  %3044 = vmatpush3.bf16.msra.mxu1 %v3043_v22 }
 0xe34   : > { %3045 = vmatprep.subr.bf16.mxu1 %v3507_v10 }
 0xefa   : > { %v2051_v57 = vpop.f32.mrb[18].mxu1 }
 0xefb   : > { %v2926_v58 = vpop.f32.mrb[19].mxu1 }
 0xefc   : > { %v2339_v58 = vsub.s32 4, %v3867_v19 }
 0xf05   : > { %v2133_v59 = vpop.f32.mrb[20].mxu1 }
 0xf06   : > { %v2933_v60 = vpop.f32.mrb[21].mxu1  ;;  %v2137_v61 = vsel %vm1263_vm4, %v2133_v59, -inf }
 0xf07   : > { %2138 = vmax.xlane.f32.xlu0 %v2137_v61  ;;  %v2340_v60 = vrot.slane %v3870_v21, %v2339_v58 }
 0xf1d   : > { %3207 = vrot.lane.b32.xlu0 %v4022_v43, %s4252_s30 }
 0xf21   : > { %2232 = vrot.lane.b32.xlu0 %v2051_v57, %s3522_s27 }
 0xf94   : > { %v2139_v42 = vpop.xlane.xlu0 %2138 }
 0xf95   : > { %v2140_v62 = vsub.f32 %v2133_v59, %v2139_v42  ;;  %v2344_v59 = vsub.s32 5, %v3867_v19 }
 0xf97   : > { %v2141_v63 = vmul.f32 1.442695, %v2140_v62  ;;  %v2345_v62 = vrot.slane %v3870_v21, %v2344_v59  ;;  %v2354_v21 = vrot.slane %v4011_v36, %v1369_v29 }
 0xf98   : > { %v3208_v0 = vpop.permute.xlu0 %3207 }
 0xf99   : > { %3243 = vpow2.f32 %v2141_v63  ;;  %v3210_v1 = vunpack.i.h.bf16 %v3208_v0  ;;  %v3209_v2 = vunpack.i.l.bf16 %v3208_v0 }
 0xf9b   : > { %v3034_v3 = vpack.c.bf16 %v3210_v1, %v3209_v2  ;;  %v2436_v1 = vld [vmem:[%s4253_s22 + $0x38] sm:$0xff] }
 0xf9c   : > { %v2233_v23 = vpop.permute.xlu0 %2232 }
 0xf9d   : > { %3035 = vmatpush3.bf16.msra.mxu0 %v3034_v3 }
 0xf9e   : > { %3036 = vmatprep.subr.bf16.mxu0 %v3507_v10 }
 0xfa3   : > { %v3244_v4 = vpop.eup %3243 }
 0xfa4   : > { %v2143_v5 = vsel %vm1263_vm4, %v3244_v4, 0.0 }
 0xfa5   : > { %2144 = vadd.xlane.f32.xlu1 %v2143_v5 }
 0xfb6   : > { %2228 = vrot.lane.b32.xlu1 %v1879_v33, %s3521_s18  ;;  %s3423_s18 = sshll.u32 %s3524_s20, 4  ;;  %s3424_s18 = int_to_ptr.vmem [resolvable:$false] %s3423_s18 }
 0xfb7   : > { %s3425_s27 = scalar_lea.vmem %s3424_s18, 256  ;;  %p3426_p0 = scmp.lt.s32.totalorder %s4168_s28, %s3424_s18 }
 0xfb8   : > { %p3427_p2 = scmp.lt.s32.totalorder %s3425_s27, %s3419_s17 }
 0xfba   : > { %p3428_p3 = por %p3427_p2, %p3426_p0 }
 0xfbc   : > { %p3429_p6 = pnand %p3428_p3, %p3422_p13 }
0x1032   : > { %v2145_v43 = vpop.xlane.xlu1 %2144 }
0x1033   : > { %3245 = vrcp.f32 %v2145_v43 }
0x1036   : > { %v2229_v17 = vpop.permute.xlu1 %2228 }
0x1037   : > { %v2239_v18 = vsel %vm589_vm2, %v4072_v31, %v2229_v17 }
0x1038   : > { %v2240_v24 = vsel %vm1263_vm4, %v2239_v18, %v2233_v23 }
0x103d   : > { %v3246_v6 = vpop.eup %3245 }
0x103e   : > { %v2147_v7 = vmul.f32 %v3246_v6, %v3244_v4  ;;  %v2440_v6 = vrot.slane %v4011_v36, %v2339_v58 }
0x1040   : > { %2939 = vmatmul.mubr.msk.f32.vlgmr.msra.gmra.mrb[16].mxu0 %vm1263_vm4, %v2147_v7 }
0x1041   : > { %2949 = vmatprep.mubr.msk.f32.mxu0 %vm3508_vm1, %v3509_v13  ;;  %3038 = vmatpush3.bf16.msra.mxu0 %v3037_v11 }
0x1042   : > { %3039 = vmatprep.subr.bf16.mxu0 %v3507_v10 }
0x1045   : > { %3041 = vmatpush3.bf16.msra.mxu0 %v3040_v14 }
0x1046   : > { %3048 = vmatprep.subr.bf16.mxu0 %v3507_v10 }
0x1113   : > { %v2223_v15 = vpop.f32.mrb[16].mxu0 }
0x1114   : > { %2236 = vrot.lane.b32.xlu1 %v2223_v15, %s3523_s25  ;;  %v2940_v16 = vpop.f32.mrb[17].mxu0  ;;  %s2718_s25 = sshll.u32 %s3601_s19, 7  ;;  %s2518_s19 = scalar_lea.sflag [#allocation4], %s3823_s2 }
0x1115   : > { %s4166_s30 = scalar_lea.hbm %s4255_s9, %s2718_s25 }
0x1186   : > { %v2237_v25 = vpop.permute.xlu1 %2236 }
0x1187   : > { %v2241_v26 = vsel %vm1265_vm5, %v2240_v24, %v2237_v25 }
0x1188   : > { %2950 = vmatmul.mubr.msk.f32.vlgmr.msra.gmra.mrb[18].mxu0 %vm480_vm0, %v2241_v26 }
0x1189   : > { %2979 = vmatprep.mubr.msk.f32.mxu0 %vm3508_vm1, %v3509_v13  ;;  %3050 = vmatpush3.bf16.msra.mxu0 %v3049_v51 }
0x118a   : > { %3051 = vmatprep.subr.bf16.mxu0 %v3507_v10 }
0x118d   : > { %3053 = vmatpush3.bf16.msra.mxu0 %v3052_v50 }
0x118e   : > { %3054 = vmatprep.subr.bf16.mxu0 %v3507_v10 }
0x1191   : > { %3056 = vmatpush3.bf16.msra.mxu0 %v3055_v54 }
0x1192   : > { %3057 = vmatprep.subr.bf16.mxu0 %v3507_v10  ;;  %v2435_v10 = vld [vmem:[%s4253_s22 + $0x30] sm:$0xff] }
0x1193   : > { %v3058_v2 = vpack.c.bf16 %v2436_v1, %v2435_v10 }
0x1195   : > { %3059 = vmatpush3.bf16.msra.mxu0 %v3058_v2 }
0x125b   : > { %v2319_v32 = vpop.f32.mrb[18].mxu0 }
0x125c   : > { %v2320_v33 = vadd.f32 %v2319_v32, %v2249_v30  ;;  %v2951_v34 = vpop.f32.mrb[19].mxu0 }
0x125e   : > { %v4116_v31 = vadd.f32 %v2320_v33, %v4005_v35  ;;  %v2349_v35 = vld [vmem:[#allocation11 + $0x10] sm:$0xff] }
0x125f   : > { %v3046_v46 = vpack.c.bf16 %v2350_v45, %v2349_v35 }
0x1260   : > { %v2324_v37 = vsel %vm480_vm0, %v4116_v31, 0.0 }
0x1261   : > { %2325 = vadd.xlane.f32.xlu0 %v2324_v37  ;;  %3047 = vmatpush3.bf16.msra.mxu1 %v3046_v46 }
0x12ee   : > { %v2326_v38 = vpop.xlane.xlu0 %2325 }
0x12ef   : > { %v2327_v39 = vmul.f32 0.03125, %v2326_v38 }
0x12f1   : > { %v2328_v40 = vsub.f32 %v4116_v31, %v2327_v39 }
0x12f3   : > { %v2329_v41 = vmul.f32 %v2328_v40, %v2328_v40 }
0x12f5   : > { %v2330_v13 = vsel %vm480_vm0, %v2329_v41, 0.0 }
0x12f6   : > { %2331 = vadd.xlane.f32.xlu1 %v2330_v13 }
0x1383   : > { %v2332_v55 = vpop.xlane.xlu1 %2331 }
0x1384   : > { %v2333_v56 = vmul.f32 0.03125, %v2332_v55 }
0x1386   : > { %v2334_v57 = vadd.f32 1e-05, %v2333_v56 }
0x1388   : > { %3247 = vrsqrt.f32 %v2334_v57 }
0x1392   : > { %v3248_v61 = vpop.eup %3247 }
0x1393   : > { %v2336_v42 = vmul.f32 %v3248_v61, %v2328_v40 }
0x1395   : > { %v2341_v63 = vmul.f32 %v2340_v60, %v2336_v42 }
0x1397   : > { %v2346_v0 = vadd.f32 %v2345_v62, %v2341_v63 }
0x1399   : > { %2961 = vmatmul.mubr.msk.f32.vlgmr.msra.gmra.mrb[22].mxu1 %vm480_vm0, %v2346_v0 }
0x146c   : > { %v2424_v3 = vpop.f32.mrb[22].mxu1 }
0x146d   : > { %v2425_v4 = vadd.f32 %v2424_v3, %v2354_v21  ;;  %v2962_v5 = vpop.f32.mrb[23].mxu1 }
0x146f   : > { %v2428_v43 = vmax.f32 %v2425_v4, 0.0 }
0x1471   : > { %2980 = vmatmul.mubr.msk.f32.vlgmr.msra.gmra.mrb[20].mxu0 %vm2441_vm7, %v2428_v43 }
0x1544   : > { %v2511_v7 = vpop.f32.mrb[20].mxu0 }
0x1545   : > { %v2512_v8 = vadd.f32 %v2511_v7, %v2440_v6  ;;  %v2981_v9 = vpop.f32.mrb[21].mxu0 }
0x1547   : > { %v2515_v19 = vadd.f32 %v2512_v8, %v4116_v31 }
0x1549   : > { %2516 = vst.msk [vmem:[%s463_s21] sm:$0xff] %vm480_vm0, %v2515_v19 }
0x154a   : > { %3432 = shalt.err (!%p3429_p6)
}
0x154b   : > { %s3433_s2 = scalar_lea.hbm %s4166_s30, 128  ;;  %s3437_s21 = scalar_lea.hbm %s4255_s9, 256 }
0x154c   : > { %p3434_p10 = scmp.ne.s32.totalorder %s4166_s30, %s3433_s2  ;;  %p3438_p5 = scmp.lt.u32.totalorder %s4166_s30, %s4255_s9 }
0x154d   : > { %p3439_p9 = scmp.lt.u32.totalorder %s3437_s21, %s3433_s2  ;;  %p3441_p4 = scmp.lt.u32.totalorder %s3433_s2, %s4166_s30 }
0x154e   : > { %p3435_p11 = pnand %p3434_p10, %p4256_p12 }
0x154f   : > { %p3440_p7 = por %p3439_p9, %p3438_p5 }
0x1550   : > { %p3436_p8 = pneg %p3435_p11 }
0x1551   : > { %p3442_p1 = por %p3441_p4, %p3440_p7 }
0x1553   : > { %p3443_p13 = pnand %p3442_p1, %p3436_p8 }
0x1555   : > { %3446 = shalt.err (!%p3443_p13)
}
0x1556   : > { %3082 = dma.vmem_to_hbm [thread:$0]  (%p4256_p12), %s4168_s28, 128, %s4166_s30, %s2518_s19  }
0x1557 PF: > { %s2543_s17 = sand.u32 1, %s3485_s13   ;;  %p4257_p0 = scmp.ne.s32.totalorder %s4240_s29, 0 }
0x1558   : > { %p4258_p2 = scmp.ge.s32.totalorder %s3497_s16, 2  ;;  %s2544_s20 = scalar_lea.sflag [#allocation4], %s2543_s17 }
0x155a   : > { %p3105_p3 = pnand %p4258_p2, %p4257_p0 }
0x155c   : > { %3480 = dma.done.wait (!%p3105_p3), %s2544_s20, 128  }
0x155d   : > { %3482 = vsyncadd (!%p3105_p3), %s2544_s20, 4294967168  ;;  %p26_p6 = scmp.ge.s32.totalorder %s3753_s11, 4   ;;  %s4259_s13 = smov %s3489_s14 }
0x155e   : > { %s4260_s14 = smov %s3493_s15  ;;  %s4261_s15 = smov %s3765_s10 }
0x155f   : > { %s4262_s16 = smov %s3753_s11  ;;  %28 = sbr.rel (!%p26_p6) target bundleno = 12 (0xc), region = 128 }
0x1566   :  { %2549 = vsyncpa [#allocation3], 1 }
0x1567   :  { %2551 = vsyncpa [#allocation3 + $0x1], 1 }
0x1568   :  { %2552 = vsyncpa [#allocation6], 1 }
0x1569   :  { %2553 = vsyncpa [#allocation9], 1 }
0x156a   :  { %2554 = vsyncpa [#allocation12], 1 }
0x156b   :  { %2555 = vsyncpa [#allocation4], 1 }
0x156c   :  { %2557 = vsyncpa [#allocation4 + $0x1], 1 }

</bundles_post_ra>
